<compile_context>
chip_gen: v7x
topology: tpu7x:2x2x1
jax: 0.10.0
libtpu: 0.0.40
codegen_flags: <defaults>
</compile_context>

<pallas_src>
import math
import functools

import jax
import jax.numpy as jnp
from jax.experimental import pallas as pl
from jax.experimental.pallas import tpu as pltpu

F32 = jnp.float32
BF16 = jnp.bfloat16
LANE = 128
EPS = 1e-5


def _round_up(x, m):
    return (x + m - 1) // m * m


def _choose_tile_m(m, target=128):
    """Pick an M tile: capped at `target`, but aim for >= 2 grid steps so both
    TensorCores get work on v7x. Always a multiple of 8 (or the full dim)."""
    if m >= 2 * target:
        return target
    half = _round_up(max(1, (m + 1) // 2), 8)
    return max(8, min(_round_up(m, 8), half))


# ----------------------------------------------------------------------------
# Pallas kernels
# ----------------------------------------------------------------------------
def _gemm_bias_act_kernel(a_ref, b_ref, bias_ref, o_ref, *, relu):
    """(TM, K)@(K, N) on the MXU (bf16 in / f32 acc) + BN bias (+ ReLU)."""
    acc = jnp.dot(a_ref[...], b_ref[...], preferred_element_type=jnp.float32)
    y = acc + bias_ref[...]
    if relu:
        y = jnp.maximum(y, 0.0)
    o_ref[...] = y.astype(o_ref.dtype)


def _gemm_bias_add_relu_kernel(a_ref, b_ref, bias_ref, s_ref, o_ref):
    """Residual-block tail: GEMM + BN bias + shortcut add + ReLU, all fused."""
    acc = jnp.dot(a_ref[...], b_ref[...], preferred_element_type=jnp.float32)
    o_ref[...] = jnp.maximum(acc + bias_ref[...] + s_ref[...], 0.0).astype(o_ref.dtype)


def _maxpool9_kernel(w_ref, o_ref):
    """Reduce the 9 pooling-window taps (leading axis) with max."""
    o_ref[...] = jnp.max(w_ref[...], axis=0)


# ----------------------------------------------------------------------------
# Conv / pool wrappers (glue: padding, im2col, reshapes)
# ----------------------------------------------------------------------------
def _im2col(x_nhwc, kh, kw, stride, pad):
    N, H, W, C = x_nhwc.shape
    OH = (H + 2 * pad - kh) // stride + 1
    OW = (W + 2 * pad - kw) // stride + 1
    if pad:
        x_nhwc = jnp.pad(x_nhwc, ((0, 0), (pad, pad), (pad, pad), (0, 0)))
    taps = [x_nhwc[:, i:i + stride * OH:stride, j:j + stride * OW:stride, :]
            for i in range(kh) for j in range(kw)]
    patches = jnp.stack(taps, axis=3).reshape(N * OH * OW, kh * kw * C)
    return patches, OH, OW


def conv_bn_act(x_nhwc, layer, *, stride, pad, relu, shortcut=None):
    """conv2d(bias=False) + BatchNorm(inference; scale folded into weights)
    + optional ReLU. When `shortcut` is given, the residual add + ReLU is fused
    into the GEMM epilogue. Channels stay padded to multiples of 128."""
    N, H, W, cin_p = x_nhwc.shape
    assert cin_p == layer["cin_pad"]
    KH, KW = layer["kh"], layer["kw"]
    Kp, Np = layer["kp"], layer["np"]

    # TODO(synk): im2col still materializes the patches once in HBM (bf16);
    # for large images replace with an implicit-patch kernel (shifted in-VMEM
    # reads over a K/tap grid axis) to avoid the 9x/49x input duplication.
    patches, OH, OW = _im2col(x_nhwc, KH, KW, stride, pad)
    patches = patches.astype(BF16)
    M, K = patches.shape
    if K != Kp:
        patches = jnp.pad(patches, ((0, 0), (0, Kp - K)))

    TM = _choose_tile_m(M)
    Mp = _round_up(M, TM)
    if Mp != M:
        patches = jnp.pad(patches, ((0, Mp - M), (0, 0)))

    bytes_accessed = (Mp * Kp * 2 + Kp * Np * 2 + Np * 4 + Mp * Np * 4
                      + (Mp * Np * 4 if shortcut is not None else 0))
    cost = pl.CostEstimate(flops=2 * Mp * Kp * Np, transcendentals=0,
                           bytes_accessed=bytes_accessed)
    cparams = pltpu.CompilerParams(dimension_semantics=("parallel",))

    if shortcut is None:
        out = pl.pallas_call(
            functools.partial(_gemm_bias_act_kernel, relu=relu),
            out_shape=jax.ShapeDtypeStruct((Mp, Np), F32),
            grid=(Mp // TM,),
            in_specs=[
                pl.BlockSpec((TM, Kp), lambda i: (i, 0)),
                pl.BlockSpec((Kp, Np), lambda i: (0, 0)),
                pl.BlockSpec((1, Np), lambda i: (0, 0)),
            ],
            out_specs=pl.BlockSpec((TM, Np), lambda i: (i, 0)),
            compiler_params=cparams,
            cost_estimate=cost,
        )(patches, layer["w"], layer["b"])
    else:
        s2d = shortcut.reshape(M, Np)
        if Mp != M:
            s2d = jnp.pad(s2d, ((0, Mp - M), (0, 0)))
        out = pl.pallas_call(
            _gemm_bias_add_relu_kernel,
            out_shape=jax.ShapeDtypeStruct((Mp, Np), F32),
            grid=(Mp // TM,),
            in_specs=[
                pl.BlockSpec((TM, Kp), lambda i: (i, 0)),
                pl.BlockSpec((Kp, Np), lambda i: (0, 0)),
                pl.BlockSpec((1, Np), lambda i: (0, 0)),
                pl.BlockSpec((TM, Np), lambda i: (i, 0)),
            ],
            out_specs=pl.BlockSpec((TM, Np), lambda i: (i, 0)),
            compiler_params=cparams,
            cost_estimate=cost,
        )(patches, layer["w"], layer["b"], s2d)

    if Mp != M:
        out = out[:M]
    return out.reshape(N, OH, OW, Np)


def maxpool_3x3_s2_p1(x_nhwc):
    N, H, W, Cp = x_nhwc.shape
    xpad = jnp.pad(x_nhwc, ((0, 0), (1, 1), (1, 1), (0, 0)),
                   constant_values=-jnp.inf)
    OH = (H - 1) // 2 + 1
    OW = (W - 1) // 2 + 1
    taps = [xpad[:, i:i + 2 * OH:2, j:j + 2 * OW:2, :]
            for i in range(3) for j in range(3)]
    wins = jnp.stack(taps, axis=0).reshape(9, N * OH * OW, Cp)
    M = N * OH * OW
    TM = _choose_tile_m(M)
    Mp = _round_up(M, TM)
    if Mp != M:
        wins = jnp.pad(wins, ((0, 0), (0, Mp - M), (0, 0)))

    out = pl.pallas_call(
        _maxpool9_kernel,
        out_shape=jax.ShapeDtypeStruct((Mp, Cp), F32),
        grid=(Mp // TM,),
        in_specs=[pl.BlockSpec((9, TM, Cp), lambda i: (0, i, 0))],
        out_specs=pl.BlockSpec((TM, Cp), lambda i: (i, 0)),
        compiler_params=pltpu.CompilerParams(dimension_semantics=("parallel",)),
        cost_estimate=pl.CostEstimate(flops=9 * Mp * Cp, transcendentals=0,
                                      bytes_accessed=(9 + 1) * Mp * Cp * 4),
    )(wins)
    if Mp != M:
        out = out[:M]
    return out.reshape(N, OH, OW, Cp)


# ----------------------------------------------------------------------------
# Parameter initialization (deterministic, matches init_layer semantics)
# ----------------------------------------------------------------------------
def _conv_init(key, cout, cin, kh, kw):
    n = kh * kw * cout
    return jax.random.normal(key, (cout, cin, kh, kw), F32) * math.sqrt(2.0 / n)


def _bn_init(c):
    # inference-mode BN with fresh stats: gamma=1, beta=0, mean=0, var=1
    scale = jnp.full((c,), 1.0 / math.sqrt(1.0 + EPS), F32)
    bias = jnp.zeros((c,), F32)
    return scale, bias


def _prep_conv_bn(w_oihw, bn_scale, bn_bias, cin_pad):
    """Fold the BN scale into the conv weights, flatten to GEMM layout
    (KH*KW*cin_pad, Np), pad channels to lane-dense multiples of 128, cast
    the weight matrix to bf16; bias stays f32 (1, Np)."""
    Cout, Cin, KH, KW = w_oihw.shape
    Np = _round_up(Cout, LANE)
    w = jnp.transpose(w_oihw, (2, 3, 1, 0)) * bn_scale[None, None, None, :]
    w = jnp.pad(w, ((0, 0), (0, 0), (0, cin_pad - Cin), (0, Np - Cout)))
    K = KH * KW * cin_pad
    Kp = _round_up(K, LANE)
    w = w.reshape(K, Np)
    if Kp != K:
        w = jnp.pad(w, ((0, Kp - K), (0, 0)))
    b = jnp.pad(bn_bias, (0, Np - Cout)).reshape(1, Np).astype(F32)
    return {"w": w.astype(BF16), "b": b, "kh": KH, "kw": KW,
            "cin_pad": cin_pad, "cout": Cout, "kp": Kp, "np": Np}


def init_resnet_params(key, list_of_num_layers, list_of_out_dims):
    assert len(list_of_num_layers) == 4, "Can have only four stages"
    keys = jax.random.split(key, 64)
    ki = iter(range(64))

    s1, b1 = _bn_init(64)
    params = {
        "conv1": _prep_conv_bn(_conv_init(keys[next(ki)], 64, 3, 7, 7),
                               s1, b1, cin_pad=3),
        "blocks": [],
    }
    indim = 64
    for i in range(4):
        for j in range(list_of_num_layers[i]):
            half_res = (i >= 1) and (j == 0)
            outdim = list_of_out_dims[i]
            cin_pad = _round_up(indim, LANE)
            sc1, bb1 = _bn_init(outdim)
            sc2, bb2 = _bn_init(outdim)
            bp = {
                "half_res": half_res,
                "has_shortcut": indim != outdim,
                "c1": _prep_conv_bn(
                    _conv_init(keys[next(ki)], outdim, indim, 3, 3),
                    sc1, bb1, cin_pad=cin_pad),
                "c2": _prep_conv_bn(
                    _conv_init(keys[next(ki)], outdim, outdim, 3, 3),
                    sc2, bb2, cin_pad=_round_up(outdim, LANE)),
            }
            if bp["has_shortcut"]:
                scs, bbs = _bn_init(outdim)
                bp["sc"] = _prep_conv_bn(
                    _conv_init(keys[next(ki)], outdim, indim, 1, 1),
                    scs, bbs, cin_pad=cin_pad)
            params["blocks"].append(bp)
            indim = outdim
    params["final_feat_dim"] = indim
    return params


# ----------------------------------------------------------------------------
# Forward pass
# ----------------------------------------------------------------------------
def _simple_block_forward(bp, x):
    stride = 2 if bp["half_res"] else 1
    h = conv_bn_act(x, bp["c1"], stride=stride, pad=1, relu=True)
    if bp["has_shortcut"]:
        short = conv_bn_act(x, bp["sc"], stride=stride, pad=0, relu=False)
    else:
        short = x
    # second conv: BN bias + residual add + ReLU fused into the GEMM epilogue
    return conv_bn_act(h, bp["c2"], stride=1, pad=1, relu=False, shortcut=short)


def resnet_forward(params, x_nchw):
    # layout: NCHW in (PyTorch), channel-padded NHWC internally
    x = jnp.transpose(x_nchw.astype(F32), (0, 2, 3, 1))
    x = conv_bn_act(x, params["conv1"], stride=2, pad=3, relu=True)
    x = maxpool_3x3_s2_p1(x)
    for bp in params["blocks"]:
        x = _simple_block_forward(bp, x)
    # AvgPool2d(kernel_size=1) is the identity; Flatten -> (N, C*H*W) in
    # PyTorch (NCHW) ordering; drop the channel padding here only.
    N = x.shape[0]
    C = params["final_feat_dim"]
    x = x[..., :C]
    return jnp.transpose(x, (0, 3, 1, 2)).reshape(N, -1)


# ----------------------------------------------------------------------------
if __name__ == "__main__":
    key = jax.random.PRNGKey(0)
    pkey, xkey = jax.random.split(key)

    # Small, MENet-consistent configuration: 4 stages, 1 block each.
    list_of_num_layers = [1, 1, 1, 1]
    list_of_out_dims = [16, 32, 64, 128]
    params = init_resnet_params(pkey, list_of_num_layers, list_of_out_dims)

    x = jax.random.normal(xkey, (2, 3, 16, 16), F32)  # NCHW input

    fwd = jax.jit(lambda inp: resnet_forward(params, inp))
    out = jax.block_until_ready(fwd(x))

    assert out.shape == (2, 128), out.shape
    assert bool(jnp.all(jnp.isfinite(out)))
    print("KERNEL_OK")
</pallas_src>

<mosaic_0001>
module attributes {stable_mosaic.version = 11 : i64} {
  func.func @_gemm_bias_act_kernel(%arg0: i32, %arg1: memref<64x256xbf16, #tpu.memory_space<vmem>>, %arg2: memref<256x128xbf16, #tpu.memory_space<vmem>>, %arg3: memref<1x128xf32, #tpu.memory_space<vmem>>, %arg4: memref<64x128xf32, #tpu.memory_space<vmem>>) attributes {dimension_semantics = [#tpu.dimension_semantics<parallel>], iteration_bounds = array<i64: 2>, scalar_prefetch = 0 : i64, scratch_operands = 0 : i64, tpu.core_type = #tpu.core_type<tc>, window_params = [{transform_indices = @transform_0, window_bounds = array<i64: 64, 256>}, {pipeline_mode = #tpu.pipeline_mode<synchronous>, transform_indices = @transform_1, window_bounds = array<i64: 256, 128>}, {pipeline_mode = #tpu.pipeline_mode<synchronous>, transform_indices = @transform_2, window_bounds = array<i64: 1, 128>}, {transform_indices = @transform_3, window_bounds = array<i64: 64, 128>}]} {
    %c0 = arith.constant 0 : index
    %c0_0 = arith.constant 0 : index
    %0 = vector.load %arg1[%c0, %c0_0] : memref<64x256xbf16, #tpu.memory_space<vmem>>, vector<64x256xbf16>
    %c0_1 = arith.constant 0 : index
    %c0_2 = arith.constant 0 : index
    %1 = vector.load %arg2[%c0_1, %c0_2] : memref<256x128xbf16, #tpu.memory_space<vmem>>, vector<256x128xbf16>
    %cst = arith.constant dense<0.000000e+00> : vector<64x128xf32>
    %2 = tpu.matmul %0, %1, %cst {dimension_numbers = #tpu.dot_dimension_numbers<[1], [0], [0], [1], [0, 0, 1, 1], [], []>} : vector<64x256xbf16>, vector<256x128xbf16>, vector<64x128xf32> -> vector<64x128xf32>
    %c0_3 = arith.constant 0 : index
    %c0_4 = arith.constant 0 : index
    %3 = vector.load %arg3[%c0_3, %c0_4] : memref<1x128xf32, #tpu.memory_space<vmem>>, vector<1x128xf32>
    %4 = vector.broadcast %3 : vector<1x128xf32> to vector<64x128xf32>
    %5 = arith.addf %2, %4 : vector<64x128xf32>
    %cst_5 = arith.constant 0.000000e+00 : f32
    %6 = vector.broadcast %cst_5 : f32 to vector<64x128xf32>
    %7 = arith.maximumf %5, %6 : vector<64x128xf32>
    %c0_6 = arith.constant 0 : index
    %c0_7 = arith.constant 0 : index
    %8 = vector.load %arg4[%c0_6, %c0_7] : memref<64x128xf32, #tpu.memory_space<vmem>>, vector<64x128xf32>
    tpu.vector_store %arg4[%c0_6, %c0_7], %7 {strides = array<i32>} : memref<64x128xf32, #tpu.memory_space<vmem>>, vector<64x128xf32>,
    return
  }
  func.func @transform_0(%arg0: i32) -> (i32, i32) {
    %c0_i32 = arith.constant 0 : i32
    %c0_i32_0 = arith.constant 0 : i32
    return %arg0, %c0_i32 : i32, i32
  }
  func.func @transform_1(%arg0: i32) -> (i32, i32) {
    %c0_i32 = arith.constant 0 : i32
    %c0_i32_0 = arith.constant 0 : i32
    %c0_i32_1 = arith.constant 0 : i32
    return %c0_i32, %c0_i32_0 : i32, i32
  }
  func.func @transform_2(%arg0: i32) -> (i32, i32) {
    %c0_i32 = arith.constant 0 : i32
    %c0_i32_0 = arith.constant 0 : i32
    %c0_i32_1 = arith.constant 0 : i32
    return %c0_i32, %c0_i32_0 : i32, i32
  }
  func.func @transform_3(%arg0: i32) -> (i32, i32) {
    %c0_i32 = arith.constant 0 : i32
    %c0_i32_0 = arith.constant 0 : i32
    return %arg0, %c0_i32 : i32, i32
  }
}

module attributes {stable_mosaic.version = 11 : i64} {
  func.func @_maxpool9_kernel(%arg0: i32, %arg1: memref<9x16x128xf32, #tpu.memory_space<vmem>>, %arg2: memref<16x128xf32, #tpu.memory_space<vmem>>) attributes {dimension_semantics = [#tpu.dimension_semantics<parallel>], iteration_bounds = array<i64: 2>, scalar_prefetch = 0 : i64, scratch_operands = 0 : i64, tpu.core_type = #tpu.core_type<tc>, window_params = [{transform_indices = @transform_0, window_bounds = array<i64: 9, 16, 128>}, {transform_indices = @transform_1, window_bounds = array<i64: 16, 128>}]} {
    %c0 = arith.constant 0 : index
    %c0_0 = arith.constant 0 : index
    %c0_1 = arith.constant 0 : index
    %0 = vector.load %arg1[%c0, %c0_0, %c0_1] : memref<9x16x128xf32, #tpu.memory_space<vmem>>, vector<9x16x128xf32>
    %cst = arith.constant dense<0xFF800000> : vector<16x128xf32>
    %1 = vector.multi_reduction <maximumf>, %0, %cst [0] : vector<9x16x128xf32> to vector<16x128xf32>
    %c0_2 = arith.constant 0 : index
    %c0_3 = arith.constant 0 : index
    %2 = vector.load %arg2[%c0_2, %c0_3] : memref<16x128xf32, #tpu.memory_space<vmem>>, vector<16x128xf32>
    tpu.vector_store %arg2[%c0_2, %c0_3], %1 {strides = array<i32>} : memref<16x128xf32, #tpu.memory_space<vmem>>, vector<16x128xf32>,
    return
  }
  func.func @transform_0(%arg0: i32) -> (i32, i32, i32) {
    %c0_i32 = arith.constant 0 : i32
    %c0_i32_0 = arith.constant 0 : i32
    %c0_i32_1 = arith.constant 0 : i32
    return %c0_i32, %arg0, %c0_i32_0 : i32, i32, i32
  }
  func.func @transform_1(%arg0: i32) -> (i32, i32) {
    %c0_i32 = arith.constant 0 : i32
    %c0_i32_0 = arith.constant 0 : i32
    return %arg0, %c0_i32 : i32, i32
  }
}

module attributes {stable_mosaic.version = 11 : i64} {
  func.func @_gemm_bias_act_kernel(%arg0: i32, %arg1: memref<16x1152xbf16, #tpu.memory_space<vmem>>, %arg2: memref<1152x128xbf16, #tpu.memory_space<vmem>>, %arg3: memref<1x128xf32, #tpu.memory_space<vmem>>, %arg4: memref<16x128xf32, #tpu.memory_space<vmem>>) attributes {dimension_semantics = [#tpu.dimension_semantics<parallel>], iteration_bounds = array<i64: 2>, scalar_prefetch = 0 : i64, scratch_operands = 0 : i64, tpu.core_type = #tpu.core_type<tc>, window_params = [{transform_indices = @transform_0, window_bounds = array<i64: 16, 1152>}, {pipeline_mode = #tpu.pipeline_mode<synchronous>, transform_indices = @transform_1, window_bounds = array<i64: 1152, 128>}, {pipeline_mode = #tpu.pipeline_mode<synchronous>, transform_indices = @transform_2, window_bounds = array<i64: 1, 128>}, {transform_indices = @transform_3, window_bounds = array<i64: 16, 128>}]} {
    %c0 = arith.constant 0 : index
    %c0_0 = arith.constant 0 : index
    %0 = vector.load %arg1[%c0, %c0_0] : memref<16x1152xbf16, #tpu.memory_space<vmem>>, vector<16x1152xbf16>
    %c0_1 = arith.constant 0 : index
    %c0_2 = arith.constant 0 : index
    %1 = vector.load %arg2[%c0_1, %c0_2] : memref<1152x128xbf16, #tpu.memory_space<vmem>>, vector<1152x128xbf16>
    %cst = arith.constant dense<0.000000e+00> : vector<16x128xf32>
    %2 = tpu.matmul %0, %1, %cst {dimension_numbers = #tpu.dot_dimension_numbers<[1], [0], [0], [1], [0, 0, 1, 1], [], []>} : vector<16x1152xbf16>, vector<1152x128xbf16>, vector<16x128xf32> -> vector<16x128xf32>
    %c0_3 = arith.constant 0 : index
    %c0_4 = arith.constant 0 : index
    %3 = vector.load %arg3[%c0_3, %c0_4] : memref<1x128xf32, #tpu.memory_space<vmem>>, vector<1x128xf32>
    %4 = vector.broadcast %3 : vector<1x128xf32> to vector<16x128xf32>
    %5 = arith.addf %2, %4 : vector<16x128xf32>
    %cst_5 = arith.constant 0.000000e+00 : f32
    %6 = vector.broadcast %cst_5 : f32 to vector<16x128xf32>
    %7 = arith.maximumf %5, %6 : vector<16x128xf32>
    %c0_6 = arith.constant 0 : index
    %c0_7 = arith.constant 0 : index
    %8 = vector.load %arg4[%c0_6, %c0_7] : memref<16x128xf32, #tpu.memory_space<vmem>>, vector<16x128xf32>
    tpu.vector_store %arg4[%c0_6, %c0_7], %7 {strides = array<i32>} : memref<16x128xf32, #tpu.memory_space<vmem>>, vector<16x128xf32>,
    return
  }
  func.func @transform_0(%arg0: i32) -> (i32, i32) {
    %c0_i32 = arith.constant 0 : i32
    %c0_i32_0 = arith.constant 0 : i32
    return %arg0, %c0_i32 : i32, i32
  }
  func.func @transform_1(%arg0: i32) -> (i32, i32) {
    %c0_i32 = arith.constant 0 : i32
    %c0_i32_0 = arith.constant 0 : i32
    %c0_i32_1 = arith.constant 0 : i32
    return %c0_i32, %c0_i32_0 : i32, i32
  }
  func.func @transform_2(%arg0: i32) -> (i32, i32) {
    %c0_i32 = arith.constant 0 : i32
    %c0_i32_0 = arith.constant 0 : i32
    %c0_i32_1 = arith.constant 0 : i32
    return %c0_i32, %c0_i32_0 : i32, i32
  }
  func.func @transform_3(%arg0: i32) -> (i32, i32) {
    %c0_i32 = arith.constant 0 : i32
    %c0_i32_0 = arith.constant 0 : i32
    return %arg0, %c0_i32 : i32, i32
  }
}

module attributes {stable_mosaic.version = 11 : i64} {
  func.func @_gemm_bias_act_kernel(%arg0: i32, %arg1: memref<16x128xbf16, #tpu.memory_space<vmem>>, %arg2: memref<128x128xbf16, #tpu.memory_space<vmem>>, %arg3: memref<1x128xf32, #tpu.memory_space<vmem>>, %arg4: memref<16x128xf32, #tpu.memory_space<vmem>>) attributes {dimension_semantics = [#tpu.dimension_semantics<parallel>], iteration_bounds = array<i64: 2>, scalar_prefetch = 0 : i64, scratch_operands = 0 : i64, tpu.core_type = #tpu.core_type<tc>, window_params = [{transform_indices = @transform_0, window_bounds = array<i64: 16, 128>}, {pipeline_mode = #tpu.pipeline_mode<synchronous>, transform_indices = @transform_1, window_bounds = array<i64: 128, 128>}, {pipeline_mode = #tpu.pipeline_mode<synchronous>, transform_indices = @transform_2, window_bounds = array<i64: 1, 128>}, {transform_indices = @transform_3, window_bounds = array<i64: 16, 128>}]} {
    %c0 = arith.constant 0 : index
    %c0_0 = arith.constant 0 : index
    %0 = vector.load %arg1[%c0, %c0_0] : memref<16x128xbf16, #tpu.memory_space<vmem>>, vector<16x128xbf16>
    %c0_1 = arith.constant 0 : index
    %c0_2 = arith.constant 0 : index
    %1 = vector.load %arg2[%c0_1, %c0_2] : memref<128x128xbf16, #tpu.memory_space<vmem>>, vector<128x128xbf16>
    %cst = arith.constant dense<0.000000e+00> : vector<16x128xf32>
    %2 = tpu.matmul %0, %1, %cst {dimension_numbers = #tpu.dot_dimension_numbers<[1], [0], [0], [1], [0, 0, 1, 1], [], []>} : vector<16x128xbf16>, vector<128x128xbf16>, vector<16x128xf32> -> vector<16x128xf32>
    %c0_3 = arith.constant 0 : index
    %c0_4 = arith.constant 0 : index
    %3 = vector.load %arg3[%c0_3, %c0_4] : memref<1x128xf32, #tpu.memory_space<vmem>>, vector<1x128xf32>
    %4 = vector.broadcast %3 : vector<1x128xf32> to vector<16x128xf32>
    %5 = arith.addf %2, %4 : vector<16x128xf32>
    %c0_5 = arith.constant 0 : index
    %c0_6 = arith.constant 0 : index
    %6 = vector.load %arg4[%c0_5, %c0_6] : memref<16x128xf32, #tpu.memory_space<vmem>>, vector<16x128xf32>
    tpu.vector_store %arg4[%c0_5, %c0_6], %5 {strides = array<i32>} : memref<16x128xf32, #tpu.memory_space<vmem>>, vector<16x128xf32>,
    return
  }
  func.func @transform_0(%arg0: i32) -> (i32, i32) {
    %c0_i32 = arith.constant 0 : i32
    %c0_i32_0 = arith.constant 0 : i32
    return %arg0, %c0_i32 : i32, i32
  }
  func.func @transform_1(%arg0: i32) -> (i32, i32) {
    %c0_i32 = arith.constant 0 : i32
    %c0_i32_0 = arith.constant 0 : i32
    %c0_i32_1 = arith.constant 0 : i32
    return %c0_i32, %c0_i32_0 : i32, i32
  }
  func.func @transform_2(%arg0: i32) -> (i32, i32) {
    %c0_i32 = arith.constant 0 : i32
    %c0_i32_0 = arith.constant 0 : i32
    %c0_i32_1 = arith.constant 0 : i32
    return %c0_i32, %c0_i32_0 : i32, i32
  }
  func.func @transform_3(%arg0: i32) -> (i32, i32) {
    %c0_i32 = arith.constant 0 : i32
    %c0_i32_0 = arith.constant 0 : i32
    return %arg0, %c0_i32 : i32, i32
  }
}

module attributes {stable_mosaic.version = 11 : i64} {
  func.func @_gemm_bias_add_relu_kernel(%arg0: i32, %arg1: memref<16x1152xbf16, #tpu.memory_space<vmem>>, %arg2: memref<1152x128xbf16, #tpu.memory_space<vmem>>, %arg3: memref<1x128xf32, #tpu.memory_space<vmem>>, %arg4: memref<16x128xf32, #tpu.memory_space<vmem>>, %arg5: memref<16x128xf32, #tpu.memory_space<vmem>>) attributes {dimension_semantics = [#tpu.dimension_semantics<parallel>], iteration_bounds = array<i64: 2>, scalar_prefetch = 0 : i64, scratch_operands = 0 : i64, tpu.core_type = #tpu.core_type<tc>, window_params = [{transform_indices = @transform_0, window_bounds = array<i64: 16, 1152>}, {pipeline_mode = #tpu.pipeline_mode<synchronous>, transform_indices = @transform_1, window_bounds = array<i64: 1152, 128>}, {pipeline_mode = #tpu.pipeline_mode<synchronous>, transform_indices = @transform_2, window_bounds = array<i64: 1, 128>}, {transform_indices = @transform_3, window_bounds = array<i64: 16, 128>}, {transform_indices = @transform_4, window_bounds = array<i64: 16, 128>}]} {
    %c0 = arith.constant 0 : index
    %c0_0 = arith.constant 0 : index
    %0 = vector.load %arg1[%c0, %c0_0] : memref<16x1152xbf16, #tpu.memory_space<vmem>>, vector<16x1152xbf16>
    %c0_1 = arith.constant 0 : index
    %c0_2 = arith.constant 0 : index
    %1 = vector.load %arg2[%c0_1, %c0_2] : memref<1152x128xbf16, #tpu.memory_space<vmem>>, vector<1152x128xbf16>
    %cst = arith.constant dense<0.000000e+00> : vector<16x128xf32>
    %2 = tpu.matmul %0, %1, %cst {dimension_numbers = #tpu.dot_dimension_numbers<[1], [0], [0], [1], [0, 0, 1, 1], [], []>} : vector<16x1152xbf16>, vector<1152x128xbf16>, vector<16x128xf32> -> vector<16x128xf32>
    %c0_3 = arith.constant 0 : index
    %c0_4 = arith.constant 0 : index
    %3 = vector.load %arg3[%c0_3, %c0_4] : memref<1x128xf32, #tpu.memory_space<vmem>>, vector<1x128xf32>
    %4 = vector.broadcast %3 : vector<1x128xf32> to vector<16x128xf32>
    %5 = arith.addf %2, %4 : vector<16x128xf32>
    %c0_5 = arith.constant 0 : index
    %c0_6 = arith.constant 0 : index
    %6 = vector.load %arg4[%c0_5, %c0_6] : memref<16x128xf32, #tpu.memory_space<vmem>>, vector<16x128xf32>
    %7 = arith.addf %5, %6 : vector<16x128xf32>
    %cst_7 = arith.constant 0.000000e+00 : f32
    %8 = vector.broadcast %cst_7 : f32 to vector<16x128xf32>
    %9 = arith.maximumf %7, %8 : vector<16x128xf32>
    %c0_8 = arith.constant 0 : index
    %c0_9 = arith.constant 0 : index
    %10 = vector.load %arg5[%c0_8, %c0_9] : memref<16x128xf32, #tpu.memory_space<vmem>>, vector<16x128xf32>
    tpu.vector_store %arg5[%c0_8, %c0_9], %9 {strides = array<i32>} : memref<16x128xf32, #tpu.memory_space<vmem>>, vector<16x128xf32>,
    return
  }
  func.func @transform_0(%arg0: i32) -> (i32, i32) {
    %c0_i32 = arith.constant 0 : i32
    %c0_i32_0 = arith.constant 0 : i32
    return %arg0, %c0_i32 : i32, i32
  }
  func.func @transform_1(%arg0: i32) -> (i32, i32) {
    %c0_i32 = arith.constant 0 : i32
    %c0_i32_0 = arith.constant 0 : i32
    %c0_i32_1 = arith.constant 0 : i32
    return %c0_i32, %c0_i32_0 : i32, i32
  }
  func.func @transform_2(%arg0: i32) -> (i32, i32) {
    %c0_i32 = arith.constant 0 : i32
    %c0_i32_0 = arith.constant 0 : i32
    %c0_i32_1 = arith.constant 0 : i32
    return %c0_i32, %c0_i32_0 : i32, i32
  }
  func.func @transform_3(%arg0: i32) -> (i32, i32) {
    %c0_i32 = arith.constant 0 : i32
    %c0_i32_0 = arith.constant 0 : i32
    return %arg0, %c0_i32 : i32, i32
  }
  func.func @transform_4(%arg0: i32) -> (i32, i32) {
    %c0_i32 = arith.constant 0 : i32
    %c0_i32_0 = arith.constant 0 : i32
    return %arg0, %c0_i32 : i32, i32
  }
}

module attributes {stable_mosaic.version = 11 : i64} {
  func.func @_gemm_bias_act_kernel(%arg0: i32, %arg1: memref<8x1152xbf16, #tpu.memory_space<vmem>>, %arg2: memref<1152x128xbf16, #tpu.memory_space<vmem>>, %arg3: memref<1x128xf32, #tpu.memory_space<vmem>>, %arg4: memref<8x128xf32, #tpu.memory_space<vmem>>) attributes {dimension_semantics = [#tpu.dimension_semantics<parallel>], iteration_bounds = array<i64: 1>, scalar_prefetch = 0 : i64, scratch_operands = 0 : i64, tpu.core_type = #tpu.core_type<tc>, window_params = [{transform_indices = @transform_0, window_bounds = array<i64: 8, 1152>}, {pipeline_mode = #tpu.pipeline_mode<synchronous>, transform_indices = @transform_1, window_bounds = array<i64: 1152, 128>}, {pipeline_mode = #tpu.pipeline_mode<synchronous>, transform_indices = @transform_2, window_bounds = array<i64: 1, 128>}, {transform_indices = @transform_3, window_bounds = array<i64: 8, 128>}]} {
    %c0 = arith.constant 0 : index
    %c0_0 = arith.constant 0 : index
    %0 = vector.load %arg1[%c0, %c0_0] : memref<8x1152xbf16, #tpu.memory_space<vmem>>, vector<8x1152xbf16>
    %c0_1 = arith.constant 0 : index
    %c0_2 = arith.constant 0 : index
    %1 = vector.load %arg2[%c0_1, %c0_2] : memref<1152x128xbf16, #tpu.memory_space<vmem>>, vector<1152x128xbf16>
    %cst = arith.constant dense<0.000000e+00> : vector<8x128xf32>
    %2 = tpu.matmul %0, %1, %cst {dimension_numbers = #tpu.dot_dimension_numbers<[1], [0], [0], [1], [0, 0, 1, 1], [], []>} : vector<8x1152xbf16>, vector<1152x128xbf16>, vector<8x128xf32> -> vector<8x128xf32>
    %c0_3 = arith.constant 0 : index
    %c0_4 = arith.constant 0 : index
    %3 = vector.load %arg3[%c0_3, %c0_4] : memref<1x128xf32, #tpu.memory_space<vmem>>, vector<1x128xf32>
    %4 = vector.broadcast %3 : vector<1x128xf32> to vector<8x128xf32>
    %5 = arith.addf %2, %4 : vector<8x128xf32>
    %cst_5 = arith.constant 0.000000e+00 : f32
    %6 = vector.broadcast %cst_5 : f32 to vector<8x128xf32>
    %7 = arith.maximumf %5, %6 : vector<8x128xf32>
    %c0_6 = arith.constant 0 : index
    %c0_7 = arith.constant 0 : index
    %8 = vector.load %arg4[%c0_6, %c0_7] : memref<8x128xf32, #tpu.memory_space<vmem>>, vector<8x128xf32>
    tpu.vector_store %arg4[%c0_6, %c0_7], %7 {strides = array<i32>} : memref<8x128xf32, #tpu.memory_space<vmem>>, vector<8x128xf32>,
    return
  }
  func.func @transform_0(%arg0: i32) -> (i32, i32) {
    %c0_i32 = arith.constant 0 : i32
    %c0_i32_0 = arith.constant 0 : i32
    return %arg0, %c0_i32 : i32, i32
  }
  func.func @transform_1(%arg0: i32) -> (i32, i32) {
    %c0_i32 = arith.constant 0 : i32
    %c0_i32_0 = arith.constant 0 : i32
    %c0_i32_1 = arith.constant 0 : i32
    return %c0_i32, %c0_i32_0 : i32, i32
  }
  func.func @transform_2(%arg0: i32) -> (i32, i32) {
    %c0_i32 = arith.constant 0 : i32
    %c0_i32_0 = arith.constant 0 : i32
    %c0_i32_1 = arith.constant 0 : i32
    return %c0_i32, %c0_i32_0 : i32, i32
  }
  func.func @transform_3(%arg0: i32) -> (i32, i32) {
    %c0_i32 = arith.constant 0 : i32
    %c0_i32_0 = arith.constant 0 : i32
    return %arg0, %c0_i32 : i32, i32
  }
}

module attributes {stable_mosaic.version = 11 : i64} {
  func.func @_gemm_bias_act_kernel(%arg0: i32, %arg1: memref<8x128xbf16, #tpu.memory_space<vmem>>, %arg2: memref<128x128xbf16, #tpu.memory_space<vmem>>, %arg3: memref<1x128xf32, #tpu.memory_space<vmem>>, %arg4: memref<8x128xf32, #tpu.memory_space<vmem>>) attributes {dimension_semantics = [#tpu.dimension_semantics<parallel>], iteration_bounds = array<i64: 1>, scalar_prefetch = 0 : i64, scratch_operands = 0 : i64, tpu.core_type = #tpu.core_type<tc>, window_params = [{transform_indices = @transform_0, window_bounds = array<i64: 8, 128>}, {pipeline_mode = #tpu.pipeline_mode<synchronous>, transform_indices = @transform_1, window_bounds = array<i64: 128, 128>}, {pipeline_mode = #tpu.pipeline_mode<synchronous>, transform_indices = @transform_2, window_bounds = array<i64: 1, 128>}, {transform_indices = @transform_3, window_bounds = array<i64: 8, 128>}]} {
    %c0 = arith.constant 0 : index
    %c0_0 = arith.constant 0 : index
    %0 = vector.load %arg1[%c0, %c0_0] : memref<8x128xbf16, #tpu.memory_space<vmem>>, vector<8x128xbf16>
    %c0_1 = arith.constant 0 : index
    %c0_2 = arith.constant 0 : index
    %1 = vector.load %arg2[%c0_1, %c0_2] : memref<128x128xbf16, #tpu.memory_space<vmem>>, vector<128x128xbf16>
    %cst = arith.constant dense<0.000000e+00> : vector<8x128xf32>
    %2 = tpu.matmul %0, %1, %cst {dimension_numbers = #tpu.dot_dimension_numbers<[1], [0], [0], [1], [0, 0, 1, 1], [], []>} : vector<8x128xbf16>, vector<128x128xbf16>, vector<8x128xf32> -> vector<8x128xf32>
    %c0_3 = arith.constant 0 : index
    %c0_4 = arith.constant 0 : index
    %3 = vector.load %arg3[%c0_3, %c0_4] : memref<1x128xf32, #tpu.memory_space<vmem>>, vector<1x128xf32>
    %4 = vector.broadcast %3 : vector<1x128xf32> to vector<8x128xf32>
    %5 = arith.addf %2, %4 : vector<8x128xf32>
    %c0_5 = arith.constant 0 : index
    %c0_6 = arith.constant 0 : index
    %6 = vector.load %arg4[%c0_5, %c0_6] : memref<8x128xf32, #tpu.memory_space<vmem>>, vector<8x128xf32>
    tpu.vector_store %arg4[%c0_5, %c0_6], %5 {strides = array<i32>} : memref<8x128xf32, #tpu.memory_space<vmem>>, vector<8x128xf32>,
    return
  }
  func.func @transform_0(%arg0: i32) -> (i32, i32) {
    %c0_i32 = arith.constant 0 : i32
    %c0_i32_0 = arith.constant 0 : i32
    return %arg0, %c0_i32 : i32, i32
  }
  func.func @transform_1(%arg0: i32) -> (i32, i32) {
    %c0_i32 = arith.constant 0 : i32
    %c0_i32_0 = arith.constant 0 : i32
    %c0_i32_1 = arith.constant 0 : i32
    return %c0_i32, %c0_i32_0 : i32, i32
  }
  func.func @transform_2(%arg0: i32) -> (i32, i32) {
    %c0_i32 = arith.constant 0 : i32
    %c0_i32_0 = arith.constant 0 : i32
    %c0_i32_1 = arith.constant 0 : i32
    return %c0_i32, %c0_i32_0 : i32, i32
  }
  func.func @transform_3(%arg0: i32) -> (i32, i32) {
    %c0_i32 = arith.constant 0 : i32
    %c0_i32_0 = arith.constant 0 : i32
    return %arg0, %c0_i32 : i32, i32
  }
}

module attributes {stable_mosaic.version = 11 : i64} {
  func.func @_gemm_bias_add_relu_kernel(%arg0: i32, %arg1: memref<8x1152xbf16, #tpu.memory_space<vmem>>, %arg2: memref<1152x128xbf16, #tpu.memory_space<vmem>>, %arg3: memref<1x128xf32, #tpu.memory_space<vmem>>, %arg4: memref<8x128xf32, #tpu.memory_space<vmem>>, %arg5: memref<8x128xf32, #tpu.memory_space<vmem>>) attributes {dimension_semantics = [#tpu.dimension_semantics<parallel>], iteration_bounds = array<i64: 1>, scalar_prefetch = 0 : i64, scratch_operands = 0 : i64, tpu.core_type = #tpu.core_type<tc>, window_params = [{transform_indices = @transform_0, window_bounds = array<i64: 8, 1152>}, {pipeline_mode = #tpu.pipeline_mode<synchronous>, transform_indices = @transform_1, window_bounds = array<i64: 1152, 128>}, {pipeline_mode = #tpu.pipeline_mode<synchronous>, transform_indices = @transform_2, window_bounds = array<i64: 1, 128>}, {transform_indices = @transform_3, window_bounds = array<i64: 8, 128>}, {transform_indices = @transform_4, window_bounds = array<i64: 8, 128>}]} {
    %c0 = arith.constant 0 : index
    %c0_0 = arith.constant 0 : index
    %0 = vector.load %arg1[%c0, %c0_0] : memref<8x1152xbf16, #tpu.memory_space<vmem>>, vector<8x1152xbf16>
    %c0_1 = arith.constant 0 : index
    %c0_2 = arith.constant 0 : index
    %1 = vector.load %arg2[%c0_1, %c0_2] : memref<1152x128xbf16, #tpu.memory_space<vmem>>, vector<1152x128xbf16>
    %cst = arith.constant dense<0.000000e+00> : vector<8x128xf32>
    %2 = tpu.matmul %0, %1, %cst {dimension_numbers = #tpu.dot_dimension_numbers<[1], [0], [0], [1], [0, 0, 1, 1], [], []>} : vector<8x1152xbf16>, vector<1152x128xbf16>, vector<8x128xf32> -> vector<8x128xf32>
    %c0_3 = arith.constant 0 : index
    %c0_4 = arith.constant 0 : index
    %3 = vector.load %arg3[%c0_3, %c0_4] : memref<1x128xf32, #tpu.memory_space<vmem>>, vector<1x128xf32>
    %4 = vector.broadcast %3 : vector<1x128xf32> to vector<8x128xf32>
    %5 = arith.addf %2, %4 : vector<8x128xf32>
    %c0_5 = arith.constant 0 : index
    %c0_6 = arith.constant 0 : index
    %6 = vector.load %arg4[%c0_5, %c0_6] : memref<8x128xf32, #tpu.memory_space<vmem>>, vector<8x128xf32>
    %7 = arith.addf %5, %6 : vector<8x128xf32>
    %cst_7 = arith.constant 0.000000e+00 : f32
    %8 = vector.broadcast %cst_7 : f32 to vector<8x128xf32>
    %9 = arith.maximumf %7, %8 : vector<8x128xf32>
    %c0_8 = arith.constant 0 : index
    %c0_9 = arith.constant 0 : index
    %10 = vector.load %arg5[%c0_8, %c0_9] : memref<8x128xf32, #tpu.memory_space<vmem>>, vector<8x128xf32>
    tpu.vector_store %arg5[%c0_8, %c0_9], %9 {strides = array<i32>} : memref<8x128xf32, #tpu.memory_space<vmem>>, vector<8x128xf32>,
    return
  }
  func.func @transform_0(%arg0: i32) -> (i32, i32) {
    %c0_i32 = arith.constant 0 : i32
    %c0_i32_0 = arith.constant 0 : i32
    return %arg0, %c0_i32 : i32, i32
  }
  func.func @transform_1(%arg0: i32) -> (i32, i32) {
    %c0_i32 = arith.constant 0 : i32
    %c0_i32_0 = arith.constant 0 : i32
    %c0_i32_1 = arith.constant 0 : i32
    return %c0_i32, %c0_i32_0 : i32, i32
  }
  func.func @transform_2(%arg0: i32) -> (i32, i32) {
    %c0_i32 = arith.constant 0 : i32
    %c0_i32_0 = arith.constant 0 : i32
    %c0_i32_1 = arith.constant 0 : i32
    return %c0_i32, %c0_i32_0 : i32, i32
  }
  func.func @transform_3(%arg0: i32) -> (i32, i32) {
    %c0_i32 = arith.constant 0 : i32
    %c0_i32_0 = arith.constant 0 : i32
    return %arg0, %c0_i32 : i32, i32
  }
  func.func @transform_4(%arg0: i32) -> (i32, i32) {
    %c0_i32 = arith.constant 0 : i32
    %c0_i32_0 = arith.constant 0 : i32
    return %arg0, %c0_i32 : i32, i32
  }
}

</mosaic_0001>

<bundles_post_ra>
// kernel: _lambda_.14
= control target key start
LH: loop header
LB: loop body
LE: loop exit
PB: predicated region body
PF: predicated region fallthrough
CT: control target
= control target key end

     0   :  { %s656_s12 = smov 0   ;;  %s751_s0 = inlined_call_operand.vmem [shape: bf16[128,256], index: 0, kind: input, shape index: {}]   ;;  %s752_s1 = inlined_call_operand.vmem [shape: bf16[256,128], index: 1, kind: input, shape index: {}]   ;;  %s753_s2 = inlined_call_operand.vmem [shape: f32[1,128], index: 2, kind: input, shape index: {}]   ;;  %s754_s3 = inlined_call_operand.vmem [shape: f32[128,128], index: 3, kind: output, shape index: {}]  }
   0x1 LB: > { %s498_s13 = sadd.s32 4294967295, %s634_s12   ;;  %p502_p0 = scmp.ge.s32.totalorder %s634_s12, 1  ;;  %s634_s12 = sphi %s656_s12, %s13_s12  }
   0x2   : > { %p139_p1 = scmp.lt.s32.totalorder %s634_s12, 3 }
   0x4   : > { %p140_p2 = pnand %p502_p0, %p139_p1 }
   0x5   : > { %v600_v0 = vld [vmem:[%s752_s1 + $0x40] sm:$0xff] (!%p140_p2)   ;;  %s503_s16 = sshll.u32 (!%p140_p2), %s498_s13, 3  ;;  %v602_v2 = vld [vmem:[%s752_s1 + $0x48] sm:$0xff] (!%p140_p2)   ;;  %v604_v4 = vld [vmem:[%s752_s1 + $0x50] sm:$0xff] (!%p140_p2)  }
   0x6   : > { %143 = sbr.rel (%p140_p2) target bundleno = 268 (0x10c), region = 32  ;;  %v601_v1 = vld [vmem:[%s752_s1] sm:$0xff] (!%p140_p2)   ;;  %536 = vmatprep.subr.bf16.mxu0 (!%p140_p2), %v600_v0  ;;  %576 = vmatprep.subr.bf16.mxu1 (!%p140_p2), %v600_v0  ;;  %v603_v3 = vld [vmem:[%s752_s1 + $0x8] sm:$0xff] (!%p140_p2)   ;;  %p165_p3 = scmp.lt.s32.totalorder (!%p140_p2), %s503_s16, 15  ;;  %v605_v5 = vld [vmem:[%s752_s1 + $0x10] sm:$0xff] (!%p140_p2)  }
   0x7   : > { %537 = vmatpush3.bf16.msra.mxu0 (!%p140_p2), %v601_v1  ;;  %584 = vmatpush3.bf16.msra.mxu1 (!%p140_p2), %v601_v1  ;;  %v606_v6 = vld [vmem:[%s752_s1 + $0x58] sm:$0xff] (!%p140_p2)   ;;  %v608_v8 = vld [vmem:[%s752_s1 + $0x60] sm:$0xff] (!%p140_p2)   ;;  %v610_v10 = vld [vmem:[%s752_s1 + $0x68] sm:$0xff] (!%p140_p2)  }
   0x8   : > { %538 = vmatprep.subr.bf16.mxu0 (!%p140_p2), %v602_v2  ;;  %577 = vmatprep.subr.bf16.mxu1 (!%p140_p2), %v602_v2  ;;  %v607_v7 = vld [vmem:[%s752_s1 + $0x18] sm:$0xff] (!%p140_p2)   ;;  %v609_v9 = vld [vmem:[%s752_s1 + $0x20] sm:$0xff] (!%p140_p2)   ;;  %v611_v13 = vld [vmem:[%s752_s1 + $0x28] sm:$0xff] (!%p140_p2)  }
   0x9   : > { %v612_v14 = vld [vmem:[%s752_s1 + $0x70] sm:$0xff] (!%p140_p2)   ;;  %v614_v16 = vld [vmem:[%s752_s1 + $0x78] sm:$0xff] (!%p140_p2)   ;;  %v508_v26 = vld [vmem:[%s753_s2] ss:$0 sm:$0xff] (!%p140_p2) }
   0xa   : > { %v613_v15 = vld [vmem:[%s752_s1 + $0x30] sm:$0xff] (!%p140_p2)   ;;  %v615_v17 = vld [vmem:[%s752_s1 + $0x38] sm:$0xff] (!%p140_p2)  }
   0xb   : > { %539 = vmatpush3.bf16.msra.mxu0 (!%p140_p2), %v603_v3  ;;  %585 = vmatpush3.bf16.msra.mxu1 (!%p140_p2), %v603_v3 }
   0xc   : > { %540 = vmatprep.subr.bf16.mxu0 (!%p140_p2), %v604_v4  ;;  %578 = vmatprep.subr.bf16.mxu1 (!%p140_p2), %v604_v4 }
   0xd   : > { %s756_s16 = smov (!%p165_p3, %s503_s16), 15 }
   0xe   : > { %s535_s4 = sshll.u32 %s756_s16, 3 }
   0xf   : > { %541 = vmatpush3.bf16.msra.mxu0 %v605_v5  ;;  %586 = vmatpush3.bf16.msra.mxu1 %v605_v5  ;;  %s699_s9 = scalar_lea.vmem %s751_s0, %s535_s4  ;;  %s738_s30 = scalar_lea.vmem %s754_s3, %s535_s4 }
  0x10   : > { %542 = vmatprep.subr.bf16.mxu0 %v606_v6  ;;  %579 = vmatprep.subr.bf16.mxu1 %v606_v6  ;;  %v618_v11 = vld [vmem:[%s699_s9 + $0x4] ss:$8 sps:$4 sm:$0xff]   ;;  %v616_v18 = vld [vmem:[%s699_s9] ss:$8 sps:$4 sm:$0xff]   ;;  %v622_v20 = vld [vmem:[%s699_s9 + $0x14] ss:$8 sps:$4 sm:$0xff]  }
  0x11   : > { %v621_v12 = vld [vmem:[%s699_s9 + $0x24] ss:$8 sps:$4 sm:$0xff]   ;;  %393 = vmatprep.mubr.bf16.mxu0 %v618_v11  ;;  %v619_v19 = vld [vmem:[%s699_s9 + $0x20] ss:$8 sps:$4 sm:$0xff]   ;;  %v624_v21 = vld [vmem:[%s699_s9 + $0x34] ss:$8 sps:$4 sm:$0xff]  }
  0x12   : > { %409 = vmatprep.mubr.bf16.mxu1 %v621_v12  ;;  %v626_v22 = vld [vmem:[%s699_s9 + $0x10] ss:$8 sps:$4 sm:$0xff]  }
  0x13   : > { %543 = vmatpush3.bf16.msra.mxu0 %v607_v7  ;;  %587 = vmatpush3.bf16.msra.mxu1 %v607_v7  ;;  %v627_v23 = vld [vmem:[%s699_s9 + $0x30] ss:$8 sps:$4 sm:$0xff]  }
  0x14   : > { %544 = vmatprep.subr.bf16.mxu0 %v608_v8  ;;  %580 = vmatprep.subr.bf16.mxu1 %v608_v8 }
  0x17   : > { %545 = vmatpush3.bf16.msra.mxu0 %v609_v9  ;;  %588 = vmatpush3.bf16.msra.mxu1 %v609_v9 }
  0x18   : > { %546 = vmatprep.subr.bf16.mxu0 %v610_v10  ;;  %581 = vmatprep.subr.bf16.mxu1 %v610_v10 }
  0x1b   : > { %547 = vmatpush3.bf16.msra.mxu0 %v611_v13  ;;  %589 = vmatpush3.bf16.msra.mxu1 %v611_v13 }
  0x1c   : > { %548 = vmatprep.subr.bf16.mxu0 %v612_v14  ;;  %582 = vmatprep.subr.bf16.mxu1 %v612_v14 }
  0x1f   : > { %549 = vmatpush3.bf16.msra.mxu0 %v613_v15  ;;  %590 = vmatpush3.bf16.msra.mxu1 %v613_v15 }
  0x20   : > { %550 = vmatprep.subr.bf16.mxu0 %v614_v16  ;;  %583 = vmatprep.subr.bf16.mxu1 %v614_v16 }
  0x23   : > { %551 = vmatpush3.bf16.msra.mxu0 %v615_v17  ;;  %591 = vmatpush3.bf16.msra.mxu1 %v615_v17 }
  0x26   : > { %394 = vmatmul.mubr.bf16.vlgmr.msra.gmra.mrb[0].mxu0 %v616_v18  ;;  %410 = vmatmul.mubr.bf16.vlgmr.msra.gmra.mrb[0].mxu1 %v619_v19 }
  0x27   : > { %401 = vmatprep.mubr.bf16.mxu0 %v622_v20  ;;  %417 = vmatprep.mubr.bf16.mxu1 %v624_v21 }
  0x2e   : > { %402 = vmatmul.mubr.bf16.gmra.mrb[4].mxu0 %v626_v22  ;;  %418 = vmatmul.mubr.bf16.gmra.mrb[4].mxu1 %v627_v23 }
  0xf9   : > { %v552_v24 = vpop.f32.mrb[0].mxu0  ;;  %v564_v25 = vpop.f32.mrb[0].mxu1 }
  0xfa   : > { %v553_v27 = vpop.f32.mrb[1].mxu0  ;;  %v565_v28 = vpop.f32.mrb[1].mxu1 }
  0xfb   : > { %v554_v29 = vadd.f32 %v553_v27, %v552_v24  ;;  %v566_v30 = vadd.f32 %v565_v28, %v564_v25  ;;  %v555_v31 = vpop.f32.mrb[2].mxu0  ;;  %v567_v32 = vpop.f32.mrb[2].mxu1 }
  0xfc   : > { %v556_v33 = vpop.f32.mrb[3].mxu0  ;;  %v568_v34 = vpop.f32.mrb[3].mxu1 }
  0xfd   : > { %v396_v35 = vadd.f32 %v554_v29, %v508_v26  ;;  %v412_v36 = vadd.f32 %v566_v30, %v508_v26  ;;  %v557_v37 = vadd.f32 %v556_v33, %v555_v31  ;;  %v569_v38 = vadd.f32 %v568_v34, %v567_v32 }
  0xff   : > { %v426_v39 = vmax.f32 %v396_v35, 0.0  ;;  %v430_v40 = vmax.f32 %v412_v36, 0.0  ;;  %v399_v41 = vadd.f32 %v557_v37, %v508_v26  ;;  %v415_v42 = vadd.f32 %v569_v38, %v508_v26 }
 0x101   : > { %434 = vst [vmem:[%s738_s30] sm:$0xff] %v426_v39  ;;  %438 = vst [vmem:[%s738_s30 + $0x20] sm:$0xff] %v430_v40  ;;  %v427_v43 = vmax.f32 %v399_v41, 0.0  ;;  %v431_v44 = vmax.f32 %v415_v42, 0.0  ;;  %v558_v45 = vpop.f32.mrb[4].mxu0  ;;  %v570_v46 = vpop.f32.mrb[4].mxu1 }
 0x102   : > { %v559_v47 = vpop.f32.mrb[5].mxu0  ;;  %v571_v48 = vpop.f32.mrb[5].mxu1 }
 0x103   : > { %435 = vst [vmem:[%s738_s30 + $0x8] sm:$0xff] %v427_v43  ;;  %439 = vst [vmem:[%s738_s30 + $0x28] sm:$0xff] %v431_v44  ;;  %v560_v49 = vadd.f32 %v559_v47, %v558_v45  ;;  %v572_v50 = vadd.f32 %v571_v48, %v570_v46  ;;  %v561_v51 = vpop.f32.mrb[6].mxu0  ;;  %v573_v52 = vpop.f32.mrb[6].mxu1 }
 0x104   : > { %v562_v53 = vpop.f32.mrb[7].mxu0  ;;  %v574_v54 = vpop.f32.mrb[7].mxu1 }
 0x105   : > { %v404_v55 = vadd.f32 %v560_v49, %v508_v26  ;;  %v420_v56 = vadd.f32 %v572_v50, %v508_v26  ;;  %v563_v57 = vadd.f32 %v562_v53, %v561_v51  ;;  %v575_v58 = vadd.f32 %v574_v54, %v573_v52 }
 0x107   : > { %v428_v59 = vmax.f32 %v404_v55, 0.0  ;;  %v432_v60 = vmax.f32 %v420_v56, 0.0  ;;  %v407_v61 = vadd.f32 %v563_v57, %v508_v26  ;;  %v423_v62 = vadd.f32 %v575_v58, %v508_v26 }
 0x109   : > { %436 = vst [vmem:[%s738_s30 + $0x10] sm:$0xff] %v428_v59  ;;  %440 = vst [vmem:[%s738_s30 + $0x30] sm:$0xff] %v432_v60  ;;  %v429_v63 = vmax.f32 %v407_v61, 0.0  ;;  %v433_v0 = vmax.f32 %v423_v62, 0.0 }
 0x10b   : > { %437 = vst [vmem:[%s738_s30 + $0x18] sm:$0xff] %v429_v63  ;;  %441 = vst [vmem:[%s738_s30 + $0x38] sm:$0xff] %v433_v0 }
 0x10c PF: > { %s13_s12 = sadd.s32 1, %s634_s12  }
 0x10d   : > { %p10_p4 = scmp.ge.s32.totalorder %s13_s12, 4  }
 0x10f   :  { %12 = sbr.rel (!%p10_p4) target bundleno = 1 (0x1), region = 62 }

// kernel: _lambda_.15
= control target key start
LH: loop header
LB: loop body
LE: loop exit
PB: predicated region body
PF: predicated region fallthrough
CT: control target
= control target key end

     0   :  { %s392_s6 = smov 0   ;;  %s394_s7 = smov 0   ;;  %s467_s0 = inlined_call_operand.vmem [shape: f32[9,32,128], index: 0, kind: input, shape index: {}]   ;;  %s468_s1 = inlined_call_operand.vmem [shape: f32[32,128], index: 1, kind: output, shape index: {}]  }
   0x1   :  { %s396_s8 = smov 0  }
   0x2 LB: > { %s320_s9 = sadd.s32 4294967295, %s380_s8   ;;  %s409_s10 = sadd.s32 1, %s380_s8   ;;  %s380_s8 = sphi %s396_s8, %s471_s8   ;;  %s376_s7 = sphi %s394_s7, %s470_s7   ;;  %s372_s6 = sphi %s392_s6, %s469_s6  }
   0x3   : > { %s15_s11 = ssub.s32 %s380_s8, %s409_s10  ;;  %s18_s12 = sadd.s32 1, %s376_s7 }
   0x4   : > { %p16_p0 = scmp.eq.s32.totalorder %s15_s11, 0  ;;  %p25_p1 = scmp.ne.s32.totalorder %s376_s7, %s372_s6 }
   0x5   : > { %p26_p2 = scmp.eq.s32.totalorder %s380_s8, 0  ;;  %p323_p4 = scmp.ge.s32.totalorder %s380_s8, 2 }
   0x6   : > { %s418_s13 = scalar_select %p16_p0, %s376_s7, %s18_s12  }
   0x7   : > { %p27_p3 = por %p26_p2, %p25_p1  ;;  %77 = sbr.rel (%p323_p4) target bundleno = 27 (0x1b), region = 16 }
   0xe   : > { %80 = sbr.rel (!%p27_p3) target bundleno = 27 (0x1b), region = 20  ;;  %s82_s14 = sand.u32 (%p27_p3), 1, %s376_s7  }
   0xf   : > { %s331_s15 = sshll.u32 (%p27_p3), %s380_s8, 4  ;;  %s332_s16 = smul.u32 (%p27_p3), 144, %s82_s14 }
  0x10   : > { %s426_s19 = scalar_lea.vmem (%p27_p3), %s467_s0, %s331_s15 }
  0x11   : > { %v149_v0 = vld [vmem:[%s426_s19] sm:$0xff] (%p27_p3)  ;;  %v151_v1 = vld [vmem:[%s426_s19 + $0x8] sm:$0xff] (%p27_p3)  ;;  %s84_s20 = scalar_lea.vmem (%p27_p3), [#allocation2], %s332_s16 }
  0x12   : > { %v153_v2 = vld [vmem:[%s426_s19 + $0x20] sm:$0xff] (%p27_p3)  ;;  %v155_v3 = vld [vmem:[%s426_s19 + $0x28] sm:$0xff] (%p27_p3)  ;;  %150 = vst [vmem:[%s84_s20] sm:$0xff] (%p27_p3), %v149_v0  ;;  %152 = vst [vmem:[%s84_s20 + $0x8] sm:$0xff] (%p27_p3), %v151_v1 }
  0x13   : > { %v157_v4 = vld [vmem:[%s426_s19 + $0x40] sm:$0xff] (%p27_p3)  ;;  %v159_v5 = vld [vmem:[%s426_s19 + $0x48] sm:$0xff] (%p27_p3)  ;;  %154 = vst [vmem:[%s84_s20 + $0x10] sm:$0xff] (%p27_p3), %v153_v2  ;;  %156 = vst [vmem:[%s84_s20 + $0x18] sm:$0xff] (%p27_p3), %v155_v3 }
  0x14   : > { %158 = vst [vmem:[%s84_s20 + $0x20] sm:$0xff] (%p27_p3), %v157_v4  ;;  %160 = vst [vmem:[%s84_s20 + $0x28] sm:$0xff] (%p27_p3), %v159_v5  ;;  %v161_v6 = vld [vmem:[%s426_s19 + $0x60] sm:$0xff] (%p27_p3)  ;;  %v163_v7 = vld [vmem:[%s426_s19 + $0x68] sm:$0xff] (%p27_p3) }
  0x15   : > { %v165_v8 = vld [vmem:[%s426_s19 + $0x80] sm:$0xff]  ;;  %162 = vst [vmem:[%s84_s20 + $0x30] sm:$0xff] %v161_v6  ;;  %164 = vst [vmem:[%s84_s20 + $0x38] sm:$0xff] %v163_v7  ;;  %v167_v9 = vld [vmem:[%s426_s19 + $0x88] sm:$0xff] }
  0x16   : > { %166 = vst [vmem:[%s84_s20 + $0x40] sm:$0xff] %v165_v8  ;;  %v169_v10 = vld [vmem:[%s426_s19 + $0xa0] sm:$0xff]  ;;  %v171_v11 = vld [vmem:[%s426_s19 + $0xa8] sm:$0xff]  ;;  %168 = vst [vmem:[%s84_s20 + $0x48] sm:$0xff] %v167_v9 }
  0x17   : > { %170 = vst [vmem:[%s84_s20 + $0x50] sm:$0xff] %v169_v10  ;;  %172 = vst [vmem:[%s84_s20 + $0x58] sm:$0xff] %v171_v11  ;;  %v173_v12 = vld [vmem:[%s426_s19 + $0xc0] sm:$0xff]  ;;  %v175_v13 = vld [vmem:[%s426_s19 + $0xc8] sm:$0xff] }
  0x18   : > { %v177_v14 = vld [vmem:[%s426_s19 + $0xe0] sm:$0xff]  ;;  %174 = vst [vmem:[%s84_s20 + $0x60] sm:$0xff] %v173_v12  ;;  %176 = vst [vmem:[%s84_s20 + $0x68] sm:$0xff] %v175_v13  ;;  %v179_v15 = vld [vmem:[%s426_s19 + $0xe8] sm:$0xff] }
  0x19   : > { %178 = vst [vmem:[%s84_s20 + $0x70] sm:$0xff] %v177_v14  ;;  %v181_v16 = vld [vmem:[%s426_s19 + $0x100] sm:$0xff]  ;;  %v183_v17 = vld [vmem:[%s426_s19 + $0x108] sm:$0xff]  ;;  %180 = vst [vmem:[%s84_s20 + $0x78] sm:$0xff] %v179_v15 }
  0x1a   : > { %182 = vst [vmem:[%s84_s20 + $0x80] sm:$0xff] %v181_v16  ;;  %184 = vst [vmem:[%s84_s20 + $0x88] sm:$0xff] %v183_v17 }
  0x1b PF: > { %p326_p5 = scmp.ge.s32.totalorder %s380_s8, 1  ;;  %p189_p6 = scmp.lt.s32.totalorder %s380_s8, 3 }
  0x1d   : > { %p190_p7 = pnand %p326_p5, %p189_p6 }
  0x1e   : > { %s196_s21 = sand.u32 (!%p190_p7), 1, %s372_s6   ;;  %s327_s22 = sshll.u32 (!%p190_p7), %s320_s9, 1 }
  0x1f   : > { %193 = sbr.rel (%p190_p7) target bundleno = 49 (0x31), region = 58  ;;  %p217_p8 = scmp.lt.s32.totalorder (!%p190_p7), %s327_s22, 3 }
  0x20   : > { %s333_s23 = smul.u32 (!%p190_p7), 144, %s196_s21 }
  0x22   : > { %s198_s24 = scalar_lea.vmem (!%p190_p7), [#allocation2], %s333_s23 }
  0x23   : > { %v222_v18 = vld [vmem:[%s198_s24] sm:$0xff] (!%p190_p7)  ;;  %v224_v19 = vld [vmem:[%s198_s24 + $0x10] sm:$0xff] (!%p190_p7)  ;;  %v223_v30 = vld [vmem:[%s198_s24 + $0x8] sm:$0xff] (!%p190_p7) }
  0x24   : > { %v226_v20 = vld [vmem:[%s198_s24 + $0x20] sm:$0xff] (!%p190_p7)  ;;  %v228_v21 = vld [vmem:[%s198_s24 + $0x30] sm:$0xff] (!%p190_p7)  ;;  %v225_v31 = vld [vmem:[%s198_s24 + $0x18] sm:$0xff] (!%p190_p7) }
  0x25   : > { %v230_v22 = vld [vmem:[%s198_s24 + $0x40] sm:$0xff] (!%p190_p7)  ;;  %v232_v23 = vld [vmem:[%s198_s24 + $0x50] sm:$0xff] (!%p190_p7)  ;;  %v240_v24 = vmax.f32 (!%p190_p7), %v222_v18, %v226_v20  ;;  %v241_v28 = vmax.f32 (!%p190_p7), %v224_v19, %v228_v21  ;;  %v227_v32 = vld [vmem:[%s198_s24 + $0x28] sm:$0xff] (!%p190_p7) }
  0x26   : > { %s473_s22 = smov (!%p217_p8, %s327_s22), 3  ;;  %v234_v25 = vld [vmem:[%s198_s24 + $0x60] sm:$0xff]  ;;  %v236_v26 = vld [vmem:[%s198_s24 + $0x70] sm:$0xff]  ;;  %v229_v34 = vld [vmem:[%s198_s24 + $0x38] sm:$0xff]  ;;  %v248_v37 = vmax.f32 %v223_v30, %v227_v32 }
  0x27   : > { %v238_v27 = vld [vmem:[%s198_s24 + $0x80] sm:$0xff]  ;;  %v242_v29 = vmax.f32 %v240_v24, %v230_v22  ;;  %v243_v33 = vmax.f32 %v241_v28, %v232_v23  ;;  %v231_v35 = vld [vmem:[%s198_s24 + $0x48] sm:$0xff]  ;;  %v233_v36 = vld [vmem:[%s198_s24 + $0x58] sm:$0xff]  ;;  %s328_s25 = sshll.u32 %s473_s22, 3  ;;  %v249_v40 = vmax.f32 %v225_v31, %v229_v34 }
  0x28   : > { %v235_v39 = vld [vmem:[%s198_s24 + $0x68] sm:$0xff]  ;;  %v237_v42 = vld [vmem:[%s198_s24 + $0x78] sm:$0xff]  ;;  %v250_v43 = vmax.f32 %v248_v37, %v231_v35  ;;  %s220_s28 = scalar_lea.vmem %s468_s1, %s328_s25 }
  0x29   : > { %v244_v38 = vmax.f32 %v242_v29, %v234_v25  ;;  %v245_v41 = vmax.f32 %v243_v33, %v236_v26  ;;  %v239_v45 = vld [vmem:[%s198_s24 + $0x88] sm:$0xff]  ;;  %v251_v46 = vmax.f32 %v249_v40, %v233_v36 }
  0x2a   : > { %v252_v47 = vmax.f32 %v250_v43, %v235_v39 }
  0x2b   : > { %v246_v44 = vmax.f32 %v244_v38, %v238_v27  ;;  %v253_v49 = vmax.f32 %v251_v46, %v237_v42 }
  0x2c   : > { %v254_v50 = vmax.f32 %v252_v47, %v239_v45 }
  0x2d   : > { %v247_v48 = vmax.f32 %v246_v44, %v245_v41 }
  0x2e   : > { %v255_v51 = vmax.f32 %v254_v50, %v253_v49 }
  0x2f   : > { %256 = vst [vmem:[%s220_s28] sm:$0xff] %v247_v48 }
  0x30   : > { %257 = vst [vmem:[%s220_s28 + $0x8] sm:$0xff] %v255_v51 }
  0x31 PF: > { %p8_p9 = scmp.ge.s32.totalorder %s409_s10, 4   ;;  %s469_s6 = smov %s376_s7 }
  0x32   : > { %s470_s7 = smov %s418_s13  ;;  %s471_s8 = smov %s409_s10 }
  0x33   :  { %10 = sbr.rel (!%p8_p9) target bundleno = 2 (0x2), region = 97 }

// kernel: _lambda_.17
= control target key start
LH: loop header
LB: loop body
LE: loop exit
PB: predicated region body
PF: predicated region fallthrough
CT: control target
= control target key end

     0   :  { %s452_s12 = smov 0   ;;  %s496_s0 = inlined_call_operand.vmem [shape: bf16[32,128], index: 0, kind: input, shape index: {}]   ;;  %s497_s1 = inlined_call_operand.vmem [shape: bf16[128,128], index: 1, kind: input, shape index: {}]   ;;  %s498_s2 = inlined_call_operand.vmem [shape: f32[1,128], index: 2, kind: input, shape index: {}]   ;;  %s499_s3 = inlined_call_operand.vmem [shape: f32[32,128], index: 3, kind: output, shape index: {}]  }
   0x1 LB: > { %s353_s13 = sadd.s32 4294967295, %s428_s12   ;;  %p357_p0 = scmp.ge.s32.totalorder %s428_s12, 1  ;;  %s428_s12 = sphi %s452_s12, %s13_s12  }
   0x2   : > { %p138_p1 = scmp.lt.s32.totalorder %s428_s12, 3 }
   0x4   : > { %p139_p2 = pnand %p357_p0, %p138_p1 }
   0x5   : > { %v413_v0 = vld [vmem:[%s497_s1] sm:$0xff] (!%p139_p2)   ;;  %v430_v1 = vmov (!%p139_p2), 0.0   ;;  %v414_v2 = vld [vmem:[%s497_s1 + $0x8] sm:$0xff] (!%p139_p2)   ;;  %vm431_vm0 = vmmov (!%p139_p2), 0   ;;  %s358_s18 = sshll.u32 (!%p139_p2), %s353_s13, 1  ;;  %v415_v3 = vld [vmem:[%s497_s1 + $0x10] sm:$0xff] (!%p139_p2)  }
   0x6   : > { %142 = sbr.rel (%p139_p2) target bundleno = 255 (0xff), region = 32  ;;  %383 = vmatprep.subr.bf16.mxu0 (!%p139_p2), %v430_v1  ;;  %399 = vmatprep.mubr.msk.bf16.mxu0 (!%p139_p2), %vm431_vm0, %v430_v1  ;;  %p163_p3 = scmp.lt.s32.totalorder (!%p139_p2), %s358_s18, 3  ;;  %v416_v4 = vld [vmem:[%s497_s1 + $0x18] sm:$0xff] (!%p139_p2)   ;;  %v417_v5 = vld [vmem:[%s497_s1 + $0x20] sm:$0xff] (!%p139_p2)   ;;  %v418_v6 = vld [vmem:[%s497_s1 + $0x28] sm:$0xff] (!%p139_p2)  }
   0x7   : > { %384 = vmatpush3.bf16.msra.mxu0 (!%p139_p2), %v413_v0  ;;  %v419_v7 = vld [vmem:[%s497_s1 + $0x30] sm:$0xff] (!%p139_p2)   ;;  %v420_v8 = vld [vmem:[%s497_s1 + $0x38] sm:$0xff] (!%p139_p2)   ;;  %v362_v10 = vld [vmem:[%s498_s2] ss:$0 sm:$0xff] (!%p139_p2) }
   0x8   : > { %385 = vmatprep.subr.bf16.mxu0 (!%p139_p2), %v430_v1 }
   0xb   : > { %386 = vmatpush3.bf16.msra.mxu0 (!%p139_p2), %v414_v2 }
   0xc   : > { %387 = vmatprep.subr.bf16.mxu0 (!%p139_p2), %v430_v1 }
   0xd   : > { %s501_s18 = smov (!%p163_p3, %s358_s18), 3 }
   0xe   : > { %s359_s21 = sshll.u32 %s501_s18, 2  ;;  %s361_s8 = sshll.u32 %s501_s18, 3 }
   0xf   : > { %s166_s24 = scalar_lea.vmem %s496_s0, %s359_s21  ;;  %388 = vmatpush3.bf16.msra.mxu0 %v415_v3  ;;  %s172_s14 = scalar_lea.vmem %s499_s3, %s361_s8 }
  0x10   : > { %389 = vmatprep.subr.bf16.mxu0 %v430_v1  ;;  %v421_v9 = vld [vmem:[%s166_s24] sm:$0xff]  }
  0x13   : > { %390 = vmatpush3.bf16.msra.mxu0 %v416_v4 }
  0x14   : > { %391 = vmatprep.subr.bf16.mxu0 %v430_v1 }
  0x17   : > { %392 = vmatpush3.bf16.msra.mxu0 %v417_v5 }
  0x18   : > { %393 = vmatprep.subr.bf16.mxu0 %v430_v1 }
  0x1b   : > { %394 = vmatpush3.bf16.msra.mxu0 %v418_v6 }
  0x1c   : > { %395 = vmatprep.subr.bf16.mxu0 %v430_v1 }
  0x1f   : > { %396 = vmatpush3.bf16.msra.mxu0 %v419_v7 }
  0x20   : > { %397 = vmatprep.subr.bf16.mxu0 %v430_v1 }
  0x23   : > { %398 = vmatpush3.bf16.msra.mxu0 %v420_v8 }
  0x26   : > { %400 = vmatmul.mubr.bf16.vlgmr.msra.gmra.mrb[0].mxu0 %v421_v9 }
  0xf9   : > { %v288_v11 = vpop.f32.mrb[0].mxu0 }
  0xfa   : > { %v289_v12 = vadd.f32 %v362_v10, %v288_v11  ;;  %v401_v13 = vpop.f32.mrb[1].mxu0 }
  0xfb   : > { %v291_v14 = vpop.f32.mrb[2].mxu0 }
  0xfc   : > { %295 = vst [vmem:[%s172_s14] sm:$0xff] %v289_v12  ;;  %v292_v15 = vadd.f32 %v362_v10, %v291_v14  ;;  %v402_v16 = vpop.f32.mrb[3].mxu0 }
  0xfe   : > { %296 = vst [vmem:[%s172_s14 + $0x8] sm:$0xff] %v292_v15 }
  0xff PF: > { %s13_s12 = sadd.s32 1, %s428_s12  }
 0x100   : > { %p10_p4 = scmp.ge.s32.totalorder %s13_s12, 4  }
 0x102   :  { %12 = sbr.rel (!%p10_p4) target bundleno = 1 (0x1), region = 62 }

// kernel: _lambda_.16
= control target key start
LH: loop header
LB: loop body
LE: loop exit
PB: predicated region body
PF: predicated region fallthrough
CT: control target
= control target key end

     0   :  { %s1418_s12 = smov 0   ;;  %s1671_s0 = inlined_call_operand.vmem [shape: bf16[32,1152], index: 0, kind: input, shape index: {}]   ;;  %s1672_s1 = inlined_call_operand.vmem [shape: bf16[1152,128], index: 1, kind: input, shape index: {}]   ;;  %s1673_s2 = inlined_call_operand.vmem [shape: f32[1,128], index: 2, kind: input, shape index: {}]   ;;  %s1674_s3 = inlined_call_operand.vmem [shape: f32[32,128], index: 3, kind: output, shape index: {}]  }
   0x1 LB: > { %s1082_s13 = sadd.s32 4294967295, %s1394_s12   ;;  %p1086_p0 = scmp.ge.s32.totalorder %s1394_s12, 1  ;;  %s1394_s12 = sphi %s1418_s12, %s13_s12  }
   0x2   : > { %p139_p1 = scmp.lt.s32.totalorder %s1394_s12, 3 }
   0x4   : > { %p140_p2 = pnand %p1086_p0, %p139_p1 }
   0x5   : > { %v1303_v0 = vld [vmem:[%s1672_s1 + $0x40] sm:$0xff] (!%p140_p2)   ;;  %v1307_v4 = vld [vmem:[%s1672_s1 + $0x48] sm:$0xff] (!%p140_p2)   ;;  %v1311_v8 = vld [vmem:[%s1672_s1 + $0x50] sm:$0xff] (!%p140_p2)   ;;  %s1087_s17 = sshll.u32 (!%p140_p2), %s1082_s13, 1  ;;  %vm1397_vm0 = vmmov (!%p140_p2), 0  }
   0x6   : > { %143 = sbr.rel (%p140_p2) target bundleno = 321 (0x141), region = 32  ;;  %v1304_v1 = vld [vmem:[%s1672_s1] sm:$0xff] (!%p140_p2)   ;;  %1175 = vmatprep.subr.bf16.mxu0 (!%p140_p2), %v1303_v0  ;;  %v1308_v5 = vld [vmem:[%s1672_s1 + $0x8] sm:$0xff] (!%p140_p2)   ;;  %v1312_v9 = vld [vmem:[%s1672_s1 + $0x10] sm:$0xff] (!%p140_p2)   ;;  %p165_p3 = scmp.lt.s32.totalorder (!%p140_p2), %s1087_s17, 3 }
   0x7   : > { %v1305_v2 = vld [vmem:[%s1672_s1 + $0xc0] sm:$0xff] (!%p140_p2)   ;;  %1176 = vmatpush3.bf16.msra.mxu0 (!%p140_p2), %v1304_v1  ;;  %v1309_v6 = vld [vmem:[%s1672_s1 + $0xc8] sm:$0xff] (!%p140_p2)   ;;  %v1313_v10 = vld [vmem:[%s1672_s1 + $0xd0] sm:$0xff] (!%p140_p2)  }
   0x8   : > { %v1306_v3 = vld [vmem:[%s1672_s1 + $0x80] sm:$0xff] (!%p140_p2)   ;;  %1197 = vmatprep.subr.bf16.mxu1 (!%p140_p2), %v1305_v2  ;;  %1177 = vmatprep.subr.bf16.mxu0 (!%p140_p2), %v1307_v4  ;;  %v1310_v7 = vld [vmem:[%s1672_s1 + $0x88] sm:$0xff] (!%p140_p2)   ;;  %v1314_v11 = vld [vmem:[%s1672_s1 + $0x90] sm:$0xff] (!%p140_p2)  }
   0x9   : > { %1198 = vmatpush3.bf16.msra.mxu1 (!%p140_p2), %v1306_v3  ;;  %v1315_v12 = vld [vmem:[%s1672_s1 + $0x58] sm:$0xff] (!%p140_p2)   ;;  %v1319_v16 = vld [vmem:[%s1672_s1 + $0x60] sm:$0xff] (!%p140_p2)   ;;  %v1323_v20 = vld [vmem:[%s1672_s1 + $0x68] sm:$0xff] (!%p140_p2)  }
   0xa   : > { %1199 = vmatprep.subr.bf16.mxu1 (!%p140_p2), %v1309_v6  ;;  %v1316_v13 = vld [vmem:[%s1672_s1 + $0x18] sm:$0xff] (!%p140_p2)   ;;  %v1320_v17 = vld [vmem:[%s1672_s1 + $0x20] sm:$0xff] (!%p140_p2)   ;;  %v1324_v21 = vld [vmem:[%s1672_s1 + $0x28] sm:$0xff] (!%p140_p2)   ;;  %v1396_v6 = vmov (!%p140_p2), 0.0  }
   0xb   : > { %1178 = vmatpush3.bf16.msra.mxu0 (!%p140_p2), %v1308_v5  ;;  %v1317_v14 = vld [vmem:[%s1672_s1 + $0xd8] sm:$0xff] (!%p140_p2)   ;;  %v1321_v18 = vld [vmem:[%s1672_s1 + $0xe0] sm:$0xff] (!%p140_p2)   ;;  %v1325_v22 = vld [vmem:[%s1672_s1 + $0xe8] sm:$0xff] (!%p140_p2)  }
   0xc   : > { %1179 = vmatprep.subr.bf16.mxu0 (!%p140_p2), %v1311_v8  ;;  %v1318_v15 = vld [vmem:[%s1672_s1 + $0x98] sm:$0xff] (!%p140_p2)   ;;  %v1322_v19 = vld [vmem:[%s1672_s1 + $0xa0] sm:$0xff] (!%p140_p2)   ;;  %v1326_v23 = vld [vmem:[%s1672_s1 + $0xa8] sm:$0xff] (!%p140_p2)  }
   0xd   : > { %1200 = vmatpush3.bf16.msra.mxu1 %v1310_v7  ;;  %s1676_s17 = smov (!%p165_p3, %s1087_s17), 3  ;;  %v1327_v24 = vld [vmem:[%s1672_s1 + $0x70] sm:$0xff]   ;;  %v1331_v28 = vld [vmem:[%s1672_s1 + $0x78] sm:$0xff]   ;;  %v1338_v34 = vld [vmem:[%s1672_s1 + $0x140] sm:$0xff]  }
   0xe   : > { %1201 = vmatprep.subr.bf16.mxu1 %v1313_v10  ;;  %s1292_s14 = smul.u32 36, %s1676_s17  ;;  %v1328_v25 = vld [vmem:[%s1672_s1 + $0x30] sm:$0xff]   ;;  %v1332_v29 = vld [vmem:[%s1672_s1 + $0x38] sm:$0xff]   ;;  %v1342_v37 = vld [vmem:[%s1672_s1 + $0x100] sm:$0xff]  }
   0xf   : > { %1180 = vmatpush3.bf16.msra.mxu0 %v1312_v9  ;;  %v1329_v26 = vld [vmem:[%s1672_s1 + $0xf0] sm:$0xff]   ;;  %v1333_v30 = vld [vmem:[%s1672_s1 + $0xf8] sm:$0xff]   ;;  %v1343_v38 = vld [vmem:[%s1672_s1 + $0x1c0] sm:$0xff]  }
  0x10   : > { %1181 = vmatprep.subr.bf16.mxu0 %v1315_v12  ;;  %v1330_v27 = vld [vmem:[%s1672_s1 + $0xb0] sm:$0xff]   ;;  %s1521_s13 = scalar_lea.vmem %s1671_s0, %s1292_s14  ;;  %v1337_v33 = vld [vmem:[%s1672_s1 + $0xb8] sm:$0xff]   ;;  %v1344_v39 = vld [vmem:[%s1672_s1 + $0x180] sm:$0xff]  }
  0x11   : > { %1202 = vmatpush3.bf16.msra.mxu1 %v1314_v11  ;;  %v1334_v31 = vld [vmem:[%s1521_s13] ss:$36 sps:$4 sm:$0xff]   ;;  %v1339_v35 = vld [vmem:[%s1521_s13 + $0x8] ss:$36 sps:$4 sm:$0xff]   ;;  %v1349_v44 = vld [vmem:[%s1672_s1 + $0x150] sm:$0xff]  }
  0x12   : > { %1203 = vmatprep.subr.bf16.mxu1 %v1317_v14  ;;  %v1336_v32 = vld [vmem:[%s1521_s13 + $0x4] ss:$36 sps:$4 sm:$0xff]   ;;  %v1341_v36 = vld [vmem:[%s1521_s13 + $0xc] ss:$36 sps:$4 sm:$0xff]   ;;  %v1353_v48 = vld [vmem:[%s1672_s1 + $0x158] sm:$0xff]  }
  0x13   : > { %1182 = vmatpush3.bf16.msra.mxu0 %v1316_v13  ;;  %849 = vmatprep.mubr.bf16.mxu0 %v1336_v32  ;;  %v1345_v40 = vld [vmem:[%s1672_s1 + $0x148] sm:$0xff]   ;;  %v1350_v45 = vld [vmem:[%s1672_s1 + $0x110] sm:$0xff]   ;;  %v1354_v49 = vld [vmem:[%s1672_s1 + $0x118] sm:$0xff]  }
  0x14   : > { %1183 = vmatprep.subr.bf16.mxu0 %v1319_v16  ;;  %890 = vmatprep.mubr.bf16.mxu1 %v1341_v36  ;;  %v1346_v41 = vld [vmem:[%s1672_s1 + $0x108] sm:$0xff]   ;;  %v1351_v46 = vld [vmem:[%s1672_s1 + $0x1d0] sm:$0xff]   ;;  %v1355_v50 = vld [vmem:[%s1672_s1 + $0x1d8] sm:$0xff]  }
  0x15   : > { %1204 = vmatpush3.bf16.msra.mxu1 %v1318_v15  ;;  %v1347_v42 = vld [vmem:[%s1672_s1 + $0x1c8] sm:$0xff]   ;;  %v1352_v47 = vld [vmem:[%s1672_s1 + $0x190] sm:$0xff]   ;;  %v1356_v51 = vld [vmem:[%s1672_s1 + $0x198] sm:$0xff]  }
  0x16   : > { %1205 = vmatprep.subr.bf16.mxu1 %v1321_v18  ;;  %v1348_v43 = vld [vmem:[%s1672_s1 + $0x188] sm:$0xff]   ;;  %v1357_v52 = vld [vmem:[%s1672_s1 + $0x160] sm:$0xff]   ;;  %v1365_v60 = vld [vmem:[%s1672_s1 + $0x170] sm:$0xff]  }
  0x17   : > { %1184 = vmatpush3.bf16.msra.mxu0 %v1320_v17  ;;  %v1358_v53 = vld [vmem:[%s1672_s1 + $0x120] sm:$0xff]   ;;  %v1361_v56 = vld [vmem:[%s1672_s1 + $0x168] sm:$0xff]   ;;  %v1366_v61 = vld [vmem:[%s1672_s1 + $0x130] sm:$0xff]  }
  0x18   : > { %1185 = vmatprep.subr.bf16.mxu0 %v1323_v20  ;;  %v1359_v54 = vld [vmem:[%s1672_s1 + $0x1e0] sm:$0xff]   ;;  %v1362_v57 = vld [vmem:[%s1672_s1 + $0x128] sm:$0xff]   ;;  %v1367_v62 = vld [vmem:[%s1672_s1 + $0x1f0] sm:$0xff]  }
  0x19   : > { %1206 = vmatpush3.bf16.msra.mxu1 %v1322_v19  ;;  %v1360_v55 = vld [vmem:[%s1672_s1 + $0x1a0] sm:$0xff]   ;;  %v1363_v58 = vld [vmem:[%s1672_s1 + $0x1e8] sm:$0xff]   ;;  %v1368_v63 = vld [vmem:[%s1672_s1 + $0x1b0] sm:$0xff]  }
  0x1a   : > { %1207 = vmatprep.subr.bf16.mxu1 %v1325_v22  ;;  %v1364_v59 = vld [vmem:[%s1672_s1 + $0x1a8] sm:$0xff]   ;;  %v1369_v0 = vld [vmem:[%s1672_s1 + $0x178] sm:$0xff]   ;;  %v1372_v3 = vld [vmem:[%s1521_s13 + $0x10] ss:$36 sps:$4 sm:$0xff]  }
  0x1b   : > { %1186 = vmatpush3.bf16.msra.mxu0 %v1324_v21  ;;  %v1370_v1 = vld [vmem:[%s1672_s1 + $0x138] sm:$0xff]   ;;  %v1379_v9 = vld [vmem:[%s1672_s1 + $0x200] sm:$0xff]   ;;  %v1380_v10 = vld [vmem:[%s1672_s1 + $0x208] sm:$0xff]  }
  0x1c   : > { %1187 = vmatprep.subr.bf16.mxu0 %v1327_v24  ;;  %v1371_v2 = vld [vmem:[%s1672_s1 + $0x1f8] sm:$0xff]   ;;  %v1381_v11 = vld [vmem:[%s1672_s1 + $0x210] sm:$0xff]   ;;  %v1383_v13 = vld [vmem:[%s1672_s1 + $0x220] sm:$0xff]  }
  0x1d   : > { %1208 = vmatpush3.bf16.msra.mxu1 %v1326_v23  ;;  %v1374_v4 = vld [vmem:[%s1521_s13 + $0x14] ss:$36 sps:$4 sm:$0xff]   ;;  %v1378_v8 = vld [vmem:[%s1521_s13 + $0x1c] ss:$36 sps:$4 sm:$0xff]   ;;  %v1384_v14 = vld [vmem:[%s1672_s1 + $0x228] sm:$0xff]  }
  0x1e   : > { %1209 = vmatprep.subr.bf16.mxu1 %v1329_v26  ;;  %v1375_v5 = vld [vmem:[%s1672_s1 + $0x1b8] sm:$0xff]   ;;  %v1385_v15 = vld [vmem:[%s1672_s1 + $0x230] sm:$0xff]   ;;  %v1387_v17 = vld [vmem:[%s1521_s13 + $0x20] ss:$36 sps:$4 sm:$0xff]  }
  0x1f   : > { %1188 = vmatpush3.bf16.msra.mxu0 %v1328_v25  ;;  %v1376_v7 = vld [vmem:[%s1521_s13 + $0x18] ss:$36 sps:$4 sm:$0xff]   ;;  %v1091_v19 = vld [vmem:[%s1673_s2] ss:$0 sm:$0xff]  ;;  %s1090_s13 = sshll.u32 %s1676_s17, 3 }
  0x20   : > { %1189 = vmatprep.subr.bf16.mxu0 %v1331_v28  ;;  %v1382_v12 = vld [vmem:[%s1672_s1 + $0x218] sm:$0xff]   ;;  %s175_s20 = scalar_lea.vmem %s1674_s3, %s1090_s13 }
  0x21   : > { %1210 = vmatpush3.bf16.msra.mxu1 %v1330_v27  ;;  %v1386_v16 = vld [vmem:[%s1672_s1 + $0x238] sm:$0xff]  }
  0x22   : > { %1211 = vmatprep.subr.bf16.mxu1 %v1333_v30 }
  0x23   : > { %1190 = vmatpush3.bf16.msra.mxu0 %v1332_v29 }
  0x24   : > { %1219 = vmatprep.subr.bf16.mxu0 %v1338_v34 }
  0x25   : > { %1212 = vmatpush3.bf16.msra.mxu1 %v1337_v33 }
  0x26   : > { %850 = vmatmul.mubr.bf16.vlgmr.msra.gmra.mrb[0].mxu0 %v1334_v31  ;;  %1241 = vmatprep.subr.bf16.mxu1 %v1343_v38 }
  0x27   : > { %1220 = vmatpush3.bf16.msra.mxu0 %v1342_v37  ;;  %931 = vmatprep.mubr.bf16.mxu0 %v1374_v4 }
  0x28   : > { %891 = vmatmul.mubr.bf16.vlgmr.msra.gmra.mrb[0].mxu1 %v1339_v35  ;;  %1221 = vmatprep.subr.bf16.mxu0 %v1345_v40 }
  0x29   : > { %1242 = vmatpush3.bf16.msra.mxu1 %v1344_v39  ;;  %972 = vmatprep.mubr.bf16.mxu1 %v1378_v8 }
  0x2a   : > { %1243 = vmatprep.subr.bf16.mxu1 %v1347_v42 }
  0x2b   : > { %1222 = vmatpush3.bf16.msra.mxu0 %v1346_v41 }
  0x2c   : > { %1223 = vmatprep.subr.bf16.mxu0 %v1349_v44 }
  0x2d   : > { %1244 = vmatpush3.bf16.msra.mxu1 %v1348_v43 }
  0x2e   : > { %1245 = vmatprep.subr.bf16.mxu1 %v1351_v46 }
  0x2f   : > { %1224 = vmatpush3.bf16.msra.mxu0 %v1350_v45 }
  0x30   : > { %1225 = vmatprep.subr.bf16.mxu0 %v1353_v48 }
  0x31   : > { %1246 = vmatpush3.bf16.msra.mxu1 %v1352_v47 }
  0x32   : > { %1247 = vmatprep.subr.bf16.mxu1 %v1355_v50 }
  0x33   : > { %1226 = vmatpush3.bf16.msra.mxu0 %v1354_v49 }
  0x34   : > { %1227 = vmatprep.subr.bf16.mxu0 %v1357_v52 }
  0x35   : > { %1248 = vmatpush3.bf16.msra.mxu1 %v1356_v51 }
  0x36   : > { %1249 = vmatprep.subr.bf16.mxu1 %v1359_v54 }
  0x37   : > { %1228 = vmatpush3.bf16.msra.mxu0 %v1358_v53 }
  0x38   : > { %1229 = vmatprep.subr.bf16.mxu0 %v1361_v56 }
  0x39   : > { %1250 = vmatpush3.bf16.msra.mxu1 %v1360_v55 }
  0x3a   : > { %1251 = vmatprep.subr.bf16.mxu1 %v1363_v58 }
  0x3b   : > { %1230 = vmatpush3.bf16.msra.mxu0 %v1362_v57 }
  0x3c   : > { %1231 = vmatprep.subr.bf16.mxu0 %v1365_v60 }
  0x3d   : > { %1252 = vmatpush3.bf16.msra.mxu1 %v1364_v59 }
  0x3e   : > { %1253 = vmatprep.subr.bf16.mxu1 %v1367_v62 }
  0x3f   : > { %1232 = vmatpush3.bf16.msra.mxu0 %v1366_v61 }
  0x40   : > { %1233 = vmatprep.subr.bf16.mxu0 %v1369_v0 }
  0x41   : > { %1254 = vmatpush3.bf16.msra.mxu1 %v1368_v63 }
  0x42   : > { %1255 = vmatprep.subr.bf16.mxu1 %v1371_v2 }
  0x43   : > { %1234 = vmatpush3.bf16.msra.mxu0 %v1370_v1 }
  0x44   : > { %1272 = vmatprep.subr.bf16.mxu0 %v1396_v6 }
  0x45   : > { %1256 = vmatpush3.bf16.msra.mxu1 %v1375_v5 }
  0x46   : > { %932 = vmatmul.mubr.bf16.vlgmr.msra.gmra.mrb[4].mxu0 %v1372_v3 }
  0x47   : > { %1288 = vmatprep.mubr.msk.bf16.mxu0 %vm1397_vm0, %v1396_v6  ;;  %1273 = vmatpush3.bf16.msra.mxu0 %v1379_v9 }
  0x48   : > { %973 = vmatmul.mubr.bf16.vlgmr.msra.gmra.mrb[4].mxu1 %v1376_v7  ;;  %1274 = vmatprep.subr.bf16.mxu0 %v1396_v6 }
  0x4b   : > { %1275 = vmatpush3.bf16.msra.mxu0 %v1380_v10 }
  0x4c   : > { %1276 = vmatprep.subr.bf16.mxu0 %v1396_v6 }
  0x4f   : > { %1277 = vmatpush3.bf16.msra.mxu0 %v1381_v11 }
  0x50   : > { %1278 = vmatprep.subr.bf16.mxu0 %v1396_v6 }
  0x53   : > { %1279 = vmatpush3.bf16.msra.mxu0 %v1382_v12 }
  0x54   : > { %1280 = vmatprep.subr.bf16.mxu0 %v1396_v6 }
  0x57   : > { %1281 = vmatpush3.bf16.msra.mxu0 %v1383_v13 }
  0x58   : > { %1282 = vmatprep.subr.bf16.mxu0 %v1396_v6 }
  0x5b   : > { %1283 = vmatpush3.bf16.msra.mxu0 %v1384_v14 }
  0x5c   : > { %1284 = vmatprep.subr.bf16.mxu0 %v1396_v6 }
  0x5f   : > { %1285 = vmatpush3.bf16.msra.mxu0 %v1385_v15 }
  0x60   : > { %1286 = vmatprep.subr.bf16.mxu0 %v1396_v6 }
  0x63   : > { %1287 = vmatpush3.bf16.msra.mxu0 %v1386_v16 }
  0x66   : > { %1289 = vmatmul.mubr.bf16.vlgmr.msra.gmra.mrb[8].mxu0 %v1387_v17 }
  0xf9   : > { %v1191_v18 = vpop.f32.mrb[0].mxu0 }
  0xfa   : > { %v1192_v20 = vpop.f32.mrb[1].mxu0 }
  0xfb   : > { %v1193_v21 = vadd.f32 %v1192_v20, %v1191_v18  ;;  %v1194_v22 = vpop.f32.mrb[2].mxu0  ;;  %v1213_v23 = vpop.f32.mrb[0].mxu1 }
  0xfc   : > { %v1195_v24 = vpop.f32.mrb[3].mxu0  ;;  %v1214_v27 = vpop.f32.mrb[1].mxu1 }
  0xfd   : > { %v852_v25 = vadd.f32 %v1193_v21, %v1091_v19  ;;  %v1196_v26 = vadd.f32 %v1195_v24, %v1194_v22  ;;  %v1215_v28 = vadd.f32 %v1214_v27, %v1213_v23  ;;  %v1216_v29 = vpop.f32.mrb[2].mxu1 }
  0xfe   : > { %v1217_v31 = vpop.f32.mrb[3].mxu1 }
  0xff   : > { %v855_v30 = vadd.f32 %v1196_v26, %v1091_v19  ;;  %v893_v32 = vadd.f32 %v1215_v28, %v852_v25  ;;  %v1218_v33 = vadd.f32 %v1217_v31, %v1216_v29 }
 0x101   : > { %v896_v34 = vadd.f32 %v1218_v33, %v855_v30 }
 0x119   : > { %v1235_v35 = vpop.f32.mrb[4].mxu0 }
 0x11a   : > { %v1236_v36 = vpop.f32.mrb[5].mxu0 }
 0x11b   : > { %v1237_v37 = vadd.f32 %v1236_v36, %v1235_v35  ;;  %v1238_v38 = vpop.f32.mrb[6].mxu0  ;;  %v1257_v39 = vpop.f32.mrb[4].mxu1 }
 0x11c   : > { %v1239_v40 = vpop.f32.mrb[7].mxu0  ;;  %v1258_v43 = vpop.f32.mrb[5].mxu1 }
 0x11d   : > { %v934_v41 = vadd.f32 %v1237_v37, %v893_v32  ;;  %v1240_v42 = vadd.f32 %v1239_v40, %v1238_v38  ;;  %v1259_v44 = vadd.f32 %v1258_v43, %v1257_v39  ;;  %v1260_v45 = vpop.f32.mrb[6].mxu1 }
 0x11e   : > { %v1261_v47 = vpop.f32.mrb[7].mxu1 }
 0x11f   : > { %v937_v46 = vadd.f32 %v1240_v42, %v896_v34  ;;  %v1262_v48 = vadd.f32 %v1261_v47, %v1260_v45  ;;  %v975_v49 = vadd.f32 %v1259_v44, %v934_v41 }
 0x121   : > { %v978_v50 = vadd.f32 %v1262_v48, %v937_v46 }
 0x139   : > { %v1015_v51 = vpop.f32.mrb[8].mxu0 }
 0x13a   : > { %v1016_v52 = vadd.f32 %v1015_v51, %v975_v49  ;;  %v1290_v53 = vpop.f32.mrb[9].mxu0 }
 0x13b   : > { %v1018_v54 = vpop.f32.mrb[10].mxu0 }
 0x13c   : > { %v1022_v55 = vmax.f32 %v1016_v52, 0.0  ;;  %v1019_v56 = vadd.f32 %v1018_v54, %v978_v50  ;;  %v1291_v57 = vpop.f32.mrb[11].mxu0 }
 0x13e   : > { %1024 = vst [vmem:[%s175_s20] sm:$0xff] %v1022_v55  ;;  %v1023_v58 = vmax.f32 %v1019_v56, 0.0 }
 0x140   : > { %1025 = vst [vmem:[%s175_s20 + $0x8] sm:$0xff] %v1023_v58 }
 0x141 PF: > { %s13_s12 = sadd.s32 1, %s1394_s12  }
 0x142   : > { %p10_p4 = scmp.ge.s32.totalorder %s13_s12, 4  }
 0x144   :  { %12 = sbr.rel (!%p10_p4) target bundleno = 1 (0x1), region = 62 }

// kernel: _lambda_.18
= control target key start
LH: loop header
LB: loop body
LE: loop exit
PB: predicated region body
PF: predicated region fallthrough
CT: control target
= control target key end

     0   :  { %s1490_s15 = smov 0   ;;  %s1746_s0 = inlined_call_operand.vmem [shape: bf16[32,1152], index: 0, kind: input, shape index: {}]   ;;  %s1747_s1 = inlined_call_operand.vmem [shape: bf16[1152,128], index: 1, kind: input, shape index: {}]   ;;  %s1748_s2 = inlined_call_operand.vmem [shape: f32[1,128], index: 2, kind: input, shape index: {}]   ;;  %s1749_s3 = inlined_call_operand.vmem [shape: f32[32,128], index: 3, kind: input, shape index: {}]   ;;  %s1750_s4 = inlined_call_operand.vmem [shape: f32[32,128], index: 4, kind: output, shape index: {}]  }
   0x1 LB: > { %s1147_s16 = sadd.s32 4294967295, %s1461_s15   ;;  %p1151_p0 = scmp.ge.s32.totalorder %s1461_s15, 1  ;;  %s1461_s15 = sphi %s1490_s15, %s14_s15  }
   0x2   : > { %p175_p1 = scmp.lt.s32.totalorder %s1461_s15, 3 }
   0x4   : > { %p176_p2 = pnand %p1151_p0, %p175_p1 }
   0x5   : > { %v1370_v0 = vld [vmem:[%s1747_s1 + $0x40] sm:$0xff] (!%p176_p2)   ;;  %v1374_v4 = vld [vmem:[%s1747_s1 + $0x48] sm:$0xff] (!%p176_p2)   ;;  %v1378_v8 = vld [vmem:[%s1747_s1 + $0x50] sm:$0xff] (!%p176_p2)   ;;  %s1152_s21 = sshll.u32 (!%p176_p2), %s1147_s16, 1  ;;  %vm1464_vm0 = vmmov (!%p176_p2), 0  }
   0x6   : > { %179 = sbr.rel (%p176_p2) target bundleno = 323 (0x143), region = 36  ;;  %v1371_v1 = vld [vmem:[%s1747_s1] sm:$0xff] (!%p176_p2)   ;;  %1242 = vmatprep.subr.bf16.mxu0 (!%p176_p2), %v1370_v0  ;;  %v1375_v5 = vld [vmem:[%s1747_s1 + $0x8] sm:$0xff] (!%p176_p2)   ;;  %v1379_v9 = vld [vmem:[%s1747_s1 + $0x10] sm:$0xff] (!%p176_p2)   ;;  %p208_p3 = scmp.lt.s32.totalorder (!%p176_p2), %s1152_s21, 3 }
   0x7   : > { %v1372_v2 = vld [vmem:[%s1747_s1 + $0xc0] sm:$0xff] (!%p176_p2)   ;;  %1243 = vmatpush3.bf16.msra.mxu0 (!%p176_p2), %v1371_v1  ;;  %v1376_v6 = vld [vmem:[%s1747_s1 + $0xc8] sm:$0xff] (!%p176_p2)   ;;  %v1380_v10 = vld [vmem:[%s1747_s1 + $0xd0] sm:$0xff] (!%p176_p2)  }
   0x8   : > { %v1373_v3 = vld [vmem:[%s1747_s1 + $0x80] sm:$0xff] (!%p176_p2)   ;;  %1264 = vmatprep.subr.bf16.mxu1 (!%p176_p2), %v1372_v2  ;;  %1244 = vmatprep.subr.bf16.mxu0 (!%p176_p2), %v1374_v4  ;;  %v1377_v7 = vld [vmem:[%s1747_s1 + $0x88] sm:$0xff] (!%p176_p2)   ;;  %v1381_v11 = vld [vmem:[%s1747_s1 + $0x90] sm:$0xff] (!%p176_p2)  }
   0x9   : > { %1265 = vmatpush3.bf16.msra.mxu1 (!%p176_p2), %v1373_v3  ;;  %v1382_v12 = vld [vmem:[%s1747_s1 + $0x58] sm:$0xff] (!%p176_p2)   ;;  %v1386_v16 = vld [vmem:[%s1747_s1 + $0x60] sm:$0xff] (!%p176_p2)   ;;  %v1390_v20 = vld [vmem:[%s1747_s1 + $0x68] sm:$0xff] (!%p176_p2)  }
   0xa   : > { %1266 = vmatprep.subr.bf16.mxu1 (!%p176_p2), %v1376_v6  ;;  %v1383_v13 = vld [vmem:[%s1747_s1 + $0x18] sm:$0xff] (!%p176_p2)   ;;  %v1387_v17 = vld [vmem:[%s1747_s1 + $0x20] sm:$0xff] (!%p176_p2)   ;;  %v1391_v21 = vld [vmem:[%s1747_s1 + $0x28] sm:$0xff] (!%p176_p2)   ;;  %v1463_v6 = vmov (!%p176_p2), 0.0  }
   0xb   : > { %1245 = vmatpush3.bf16.msra.mxu0 (!%p176_p2), %v1375_v5  ;;  %v1384_v14 = vld [vmem:[%s1747_s1 + $0xd8] sm:$0xff] (!%p176_p2)   ;;  %v1388_v18 = vld [vmem:[%s1747_s1 + $0xe0] sm:$0xff] (!%p176_p2)   ;;  %v1392_v22 = vld [vmem:[%s1747_s1 + $0xe8] sm:$0xff] (!%p176_p2)  }
   0xc   : > { %1246 = vmatprep.subr.bf16.mxu0 (!%p176_p2), %v1378_v8  ;;  %v1385_v15 = vld [vmem:[%s1747_s1 + $0x98] sm:$0xff] (!%p176_p2)   ;;  %v1389_v19 = vld [vmem:[%s1747_s1 + $0xa0] sm:$0xff] (!%p176_p2)   ;;  %v1393_v23 = vld [vmem:[%s1747_s1 + $0xa8] sm:$0xff] (!%p176_p2)  }
   0xd   : > { %1267 = vmatpush3.bf16.msra.mxu1 %v1377_v7  ;;  %s1752_s21 = smov (!%p208_p3, %s1152_s21), 3  ;;  %v1394_v24 = vld [vmem:[%s1747_s1 + $0x70] sm:$0xff]   ;;  %v1398_v28 = vld [vmem:[%s1747_s1 + $0x78] sm:$0xff]   ;;  %v1405_v34 = vld [vmem:[%s1747_s1 + $0x140] sm:$0xff]  }
   0xe   : > { %1268 = vmatprep.subr.bf16.mxu1 %v1380_v10  ;;  %s1359_s19 = smul.u32 36, %s1752_s21  ;;  %v1395_v25 = vld [vmem:[%s1747_s1 + $0x30] sm:$0xff]   ;;  %v1399_v29 = vld [vmem:[%s1747_s1 + $0x38] sm:$0xff]   ;;  %v1409_v37 = vld [vmem:[%s1747_s1 + $0x100] sm:$0xff]  }
   0xf   : > { %1247 = vmatpush3.bf16.msra.mxu0 %v1379_v9  ;;  %v1396_v26 = vld [vmem:[%s1747_s1 + $0xf0] sm:$0xff]   ;;  %v1400_v30 = vld [vmem:[%s1747_s1 + $0xf8] sm:$0xff]   ;;  %v1410_v38 = vld [vmem:[%s1747_s1 + $0x1c0] sm:$0xff]  }
  0x10   : > { %1248 = vmatprep.subr.bf16.mxu0 %v1382_v12  ;;  %v1397_v27 = vld [vmem:[%s1747_s1 + $0xb0] sm:$0xff]   ;;  %s1593_s30 = scalar_lea.vmem %s1746_s0, %s1359_s19  ;;  %v1404_v33 = vld [vmem:[%s1747_s1 + $0xb8] sm:$0xff]   ;;  %v1411_v39 = vld [vmem:[%s1747_s1 + $0x180] sm:$0xff]  }
  0x11   : > { %1269 = vmatpush3.bf16.msra.mxu1 %v1381_v11  ;;  %v1401_v31 = vld [vmem:[%s1593_s30] ss:$36 sps:$4 sm:$0xff]   ;;  %v1406_v35 = vld [vmem:[%s1593_s30 + $0x8] ss:$36 sps:$4 sm:$0xff]   ;;  %v1416_v44 = vld [vmem:[%s1747_s1 + $0x150] sm:$0xff]  }
  0x12   : > { %1270 = vmatprep.subr.bf16.mxu1 %v1384_v14  ;;  %v1403_v32 = vld [vmem:[%s1593_s30 + $0x4] ss:$36 sps:$4 sm:$0xff]   ;;  %v1408_v36 = vld [vmem:[%s1593_s30 + $0xc] ss:$36 sps:$4 sm:$0xff]   ;;  %v1420_v48 = vld [vmem:[%s1747_s1 + $0x158] sm:$0xff]  }
  0x13   : > { %1249 = vmatpush3.bf16.msra.mxu0 %v1383_v13  ;;  %898 = vmatprep.mubr.bf16.mxu0 %v1403_v32  ;;  %v1412_v40 = vld [vmem:[%s1747_s1 + $0x148] sm:$0xff]   ;;  %v1417_v45 = vld [vmem:[%s1747_s1 + $0x110] sm:$0xff]   ;;  %v1421_v49 = vld [vmem:[%s1747_s1 + $0x118] sm:$0xff]  }
  0x14   : > { %1250 = vmatprep.subr.bf16.mxu0 %v1386_v16  ;;  %939 = vmatprep.mubr.bf16.mxu1 %v1408_v36  ;;  %v1413_v41 = vld [vmem:[%s1747_s1 + $0x108] sm:$0xff]   ;;  %v1418_v46 = vld [vmem:[%s1747_s1 + $0x1d0] sm:$0xff]   ;;  %v1422_v50 = vld [vmem:[%s1747_s1 + $0x1d8] sm:$0xff]  }
  0x15   : > { %1271 = vmatpush3.bf16.msra.mxu1 %v1385_v15  ;;  %v1414_v42 = vld [vmem:[%s1747_s1 + $0x1c8] sm:$0xff]   ;;  %v1419_v47 = vld [vmem:[%s1747_s1 + $0x190] sm:$0xff]   ;;  %v1423_v51 = vld [vmem:[%s1747_s1 + $0x198] sm:$0xff]  }
  0x16   : > { %1272 = vmatprep.subr.bf16.mxu1 %v1388_v18  ;;  %v1415_v43 = vld [vmem:[%s1747_s1 + $0x188] sm:$0xff]   ;;  %v1424_v52 = vld [vmem:[%s1747_s1 + $0x160] sm:$0xff]   ;;  %v1432_v60 = vld [vmem:[%s1747_s1 + $0x170] sm:$0xff]  }
  0x17   : > { %1251 = vmatpush3.bf16.msra.mxu0 %v1387_v17  ;;  %v1425_v53 = vld [vmem:[%s1747_s1 + $0x120] sm:$0xff]   ;;  %v1428_v56 = vld [vmem:[%s1747_s1 + $0x168] sm:$0xff]   ;;  %v1433_v61 = vld [vmem:[%s1747_s1 + $0x130] sm:$0xff]  }
  0x18   : > { %1252 = vmatprep.subr.bf16.mxu0 %v1390_v20  ;;  %v1426_v54 = vld [vmem:[%s1747_s1 + $0x1e0] sm:$0xff]   ;;  %v1429_v57 = vld [vmem:[%s1747_s1 + $0x128] sm:$0xff]   ;;  %v1434_v62 = vld [vmem:[%s1747_s1 + $0x1f0] sm:$0xff]  }
  0x19   : > { %1273 = vmatpush3.bf16.msra.mxu1 %v1389_v19  ;;  %v1427_v55 = vld [vmem:[%s1747_s1 + $0x1a0] sm:$0xff]   ;;  %v1430_v58 = vld [vmem:[%s1747_s1 + $0x1e8] sm:$0xff]   ;;  %v1435_v63 = vld [vmem:[%s1747_s1 + $0x1b0] sm:$0xff]  }
  0x1a   : > { %1274 = vmatprep.subr.bf16.mxu1 %v1392_v22  ;;  %v1431_v59 = vld [vmem:[%s1747_s1 + $0x1a8] sm:$0xff]   ;;  %v1436_v0 = vld [vmem:[%s1747_s1 + $0x178] sm:$0xff]   ;;  %v1439_v3 = vld [vmem:[%s1593_s30 + $0x10] ss:$36 sps:$4 sm:$0xff]  }
  0x1b   : > { %1253 = vmatpush3.bf16.msra.mxu0 %v1391_v21  ;;  %v1437_v1 = vld [vmem:[%s1747_s1 + $0x138] sm:$0xff]   ;;  %v1446_v9 = vld [vmem:[%s1747_s1 + $0x200] sm:$0xff]   ;;  %v1447_v10 = vld [vmem:[%s1747_s1 + $0x208] sm:$0xff]  }
  0x1c   : > { %1254 = vmatprep.subr.bf16.mxu0 %v1394_v24  ;;  %v1438_v2 = vld [vmem:[%s1747_s1 + $0x1f8] sm:$0xff]   ;;  %v1448_v11 = vld [vmem:[%s1747_s1 + $0x210] sm:$0xff]   ;;  %v1450_v13 = vld [vmem:[%s1747_s1 + $0x220] sm:$0xff]  }
  0x1d   : > { %1275 = vmatpush3.bf16.msra.mxu1 %v1393_v23  ;;  %v1441_v4 = vld [vmem:[%s1593_s30 + $0x14] ss:$36 sps:$4 sm:$0xff]   ;;  %v1445_v8 = vld [vmem:[%s1593_s30 + $0x1c] ss:$36 sps:$4 sm:$0xff]   ;;  %v1451_v14 = vld [vmem:[%s1747_s1 + $0x228] sm:$0xff]  }
  0x1e   : > { %1276 = vmatprep.subr.bf16.mxu1 %v1396_v26  ;;  %v1442_v5 = vld [vmem:[%s1747_s1 + $0x1b8] sm:$0xff]   ;;  %v1452_v15 = vld [vmem:[%s1747_s1 + $0x230] sm:$0xff]   ;;  %v1454_v17 = vld [vmem:[%s1593_s30 + $0x20] ss:$36 sps:$4 sm:$0xff]  }
  0x1f   : > { %1255 = vmatpush3.bf16.msra.mxu0 %v1395_v25  ;;  %v1443_v7 = vld [vmem:[%s1593_s30 + $0x18] ss:$36 sps:$4 sm:$0xff]   ;;  %v1158_v19 = vld [vmem:[%s1748_s2] ss:$0 sm:$0xff]  ;;  %s1155_s30 = sshll.u32 %s1752_s21, 3 }
  0x20   : > { %1256 = vmatprep.subr.bf16.mxu0 %v1398_v28  ;;  %v1449_v12 = vld [vmem:[%s1747_s1 + $0x218] sm:$0xff]   ;;  %s218_s29 = scalar_lea.vmem %s1749_s3, %s1155_s30  ;;  %s224_s6 = scalar_lea.vmem %s1750_s4, %s1155_s30 }
  0x21   : > { %1277 = vmatpush3.bf16.msra.mxu1 %v1397_v27  ;;  %v1453_v16 = vld [vmem:[%s1747_s1 + $0x238] sm:$0xff]  }
  0x22   : > { %1278 = vmatprep.subr.bf16.mxu1 %v1400_v30 }
  0x23   : > { %1257 = vmatpush3.bf16.msra.mxu0 %v1399_v29 }
  0x24   : > { %1286 = vmatprep.subr.bf16.mxu0 %v1405_v34 }
  0x25   : > { %1279 = vmatpush3.bf16.msra.mxu1 %v1404_v33 }
  0x26   : > { %899 = vmatmul.mubr.bf16.vlgmr.msra.gmra.mrb[0].mxu0 %v1401_v31  ;;  %1308 = vmatprep.subr.bf16.mxu1 %v1410_v38 }
  0x27   : > { %1287 = vmatpush3.bf16.msra.mxu0 %v1409_v37  ;;  %980 = vmatprep.mubr.bf16.mxu0 %v1441_v4 }
  0x28   : > { %940 = vmatmul.mubr.bf16.vlgmr.msra.gmra.mrb[0].mxu1 %v1406_v35  ;;  %1288 = vmatprep.subr.bf16.mxu0 %v1412_v40 }
  0x29   : > { %1309 = vmatpush3.bf16.msra.mxu1 %v1411_v39  ;;  %1021 = vmatprep.mubr.bf16.mxu1 %v1445_v8 }
  0x2a   : > { %1310 = vmatprep.subr.bf16.mxu1 %v1414_v42 }
  0x2b   : > { %1289 = vmatpush3.bf16.msra.mxu0 %v1413_v41 }
  0x2c   : > { %1290 = vmatprep.subr.bf16.mxu0 %v1416_v44 }
  0x2d   : > { %1311 = vmatpush3.bf16.msra.mxu1 %v1415_v43 }
  0x2e   : > { %1312 = vmatprep.subr.bf16.mxu1 %v1418_v46 }
  0x2f   : > { %1291 = vmatpush3.bf16.msra.mxu0 %v1417_v45 }
  0x30   : > { %1292 = vmatprep.subr.bf16.mxu0 %v1420_v48 }
  0x31   : > { %1313 = vmatpush3.bf16.msra.mxu1 %v1419_v47 }
  0x32   : > { %1314 = vmatprep.subr.bf16.mxu1 %v1422_v50 }
  0x33   : > { %1293 = vmatpush3.bf16.msra.mxu0 %v1421_v49 }
  0x34   : > { %1294 = vmatprep.subr.bf16.mxu0 %v1424_v52  ;;  %v1071_v52 = vld [vmem:[%s218_s29] sm:$0xff] }
  0x35   : > { %1315 = vmatpush3.bf16.msra.mxu1 %v1423_v51 }
  0x36   : > { %1316 = vmatprep.subr.bf16.mxu1 %v1426_v54 }
  0x37   : > { %1295 = vmatpush3.bf16.msra.mxu0 %v1425_v53 }
  0x38   : > { %1296 = vmatprep.subr.bf16.mxu0 %v1428_v56  ;;  %v1072_v56 = vld [vmem:[%s218_s29 + $0x8] sm:$0xff] }
  0x39   : > { %1317 = vmatpush3.bf16.msra.mxu1 %v1427_v55 }
  0x3a   : > { %1318 = vmatprep.subr.bf16.mxu1 %v1430_v58 }
  0x3b   : > { %1297 = vmatpush3.bf16.msra.mxu0 %v1429_v57 }
  0x3c   : > { %1298 = vmatprep.subr.bf16.mxu0 %v1432_v60 }
  0x3d   : > { %1319 = vmatpush3.bf16.msra.mxu1 %v1431_v59 }
  0x3e   : > { %1320 = vmatprep.subr.bf16.mxu1 %v1434_v62 }
  0x3f   : > { %1299 = vmatpush3.bf16.msra.mxu0 %v1433_v61 }
  0x40   : > { %1300 = vmatprep.subr.bf16.mxu0 %v1436_v0 }
  0x41   : > { %1321 = vmatpush3.bf16.msra.mxu1 %v1435_v63 }
  0x42   : > { %1322 = vmatprep.subr.bf16.mxu1 %v1438_v2 }
  0x43   : > { %1301 = vmatpush3.bf16.msra.mxu0 %v1437_v1 }
  0x44   : > { %1339 = vmatprep.subr.bf16.mxu0 %v1463_v6 }
  0x45   : > { %1323 = vmatpush3.bf16.msra.mxu1 %v1442_v5 }
  0x46   : > { %981 = vmatmul.mubr.bf16.vlgmr.msra.gmra.mrb[4].mxu0 %v1439_v3 }
  0x47   : > { %1355 = vmatprep.mubr.msk.bf16.mxu0 %vm1464_vm0, %v1463_v6  ;;  %1340 = vmatpush3.bf16.msra.mxu0 %v1446_v9 }
  0x48   : > { %1022 = vmatmul.mubr.bf16.vlgmr.msra.gmra.mrb[4].mxu1 %v1443_v7  ;;  %1341 = vmatprep.subr.bf16.mxu0 %v1463_v6 }
  0x4b   : > { %1342 = vmatpush3.bf16.msra.mxu0 %v1447_v10 }
  0x4c   : > { %1343 = vmatprep.subr.bf16.mxu0 %v1463_v6 }
  0x4f   : > { %1344 = vmatpush3.bf16.msra.mxu0 %v1448_v11 }
  0x50   : > { %1345 = vmatprep.subr.bf16.mxu0 %v1463_v6 }
  0x53   : > { %1346 = vmatpush3.bf16.msra.mxu0 %v1449_v12 }
  0x54   : > { %1347 = vmatprep.subr.bf16.mxu0 %v1463_v6 }
  0x57   : > { %1348 = vmatpush3.bf16.msra.mxu0 %v1450_v13 }
  0x58   : > { %1349 = vmatprep.subr.bf16.mxu0 %v1463_v6 }
  0x5b   : > { %1350 = vmatpush3.bf16.msra.mxu0 %v1451_v14 }
  0x5c   : > { %1351 = vmatprep.subr.bf16.mxu0 %v1463_v6 }
  0x5f   : > { %1352 = vmatpush3.bf16.msra.mxu0 %v1452_v15 }
  0x60   : > { %1353 = vmatprep.subr.bf16.mxu0 %v1463_v6 }
  0x63   : > { %1354 = vmatpush3.bf16.msra.mxu0 %v1453_v16 }
  0x66   : > { %1356 = vmatmul.mubr.bf16.vlgmr.msra.gmra.mrb[8].mxu0 %v1454_v17 }
  0xf9   : > { %v1258_v18 = vpop.f32.mrb[0].mxu0 }
  0xfa   : > { %v1259_v20 = vpop.f32.mrb[1].mxu0 }
  0xfb   : > { %v1260_v21 = vadd.f32 %v1259_v20, %v1258_v18  ;;  %v1261_v22 = vpop.f32.mrb[2].mxu0  ;;  %v1280_v23 = vpop.f32.mrb[0].mxu1 }
  0xfc   : > { %v1262_v24 = vpop.f32.mrb[3].mxu0  ;;  %v1281_v27 = vpop.f32.mrb[1].mxu1 }
  0xfd   : > { %v901_v25 = vadd.f32 %v1260_v21, %v1158_v19  ;;  %v1263_v26 = vadd.f32 %v1262_v24, %v1261_v22  ;;  %v1282_v28 = vadd.f32 %v1281_v27, %v1280_v23  ;;  %v1283_v29 = vpop.f32.mrb[2].mxu1 }
  0xfe   : > { %v1284_v31 = vpop.f32.mrb[3].mxu1 }
  0xff   : > { %v904_v30 = vadd.f32 %v1263_v26, %v1158_v19  ;;  %v942_v32 = vadd.f32 %v1282_v28, %v901_v25  ;;  %v1285_v33 = vadd.f32 %v1284_v31, %v1283_v29 }
 0x101   : > { %v945_v34 = vadd.f32 %v1285_v33, %v904_v30 }
 0x119   : > { %v1302_v35 = vpop.f32.mrb[4].mxu0 }
 0x11a   : > { %v1303_v36 = vpop.f32.mrb[5].mxu0 }
 0x11b   : > { %v1304_v37 = vadd.f32 %v1303_v36, %v1302_v35  ;;  %v1305_v38 = vpop.f32.mrb[6].mxu0  ;;  %v1324_v39 = vpop.f32.mrb[4].mxu1 }
 0x11c   : > { %v1306_v40 = vpop.f32.mrb[7].mxu0  ;;  %v1325_v43 = vpop.f32.mrb[5].mxu1 }
 0x11d   : > { %v983_v41 = vadd.f32 %v1304_v37, %v942_v32  ;;  %v1307_v42 = vadd.f32 %v1306_v40, %v1305_v38  ;;  %v1326_v44 = vadd.f32 %v1325_v43, %v1324_v39  ;;  %v1327_v45 = vpop.f32.mrb[6].mxu1 }
 0x11e   : > { %v1328_v47 = vpop.f32.mrb[7].mxu1 }
 0x11f   : > { %v986_v46 = vadd.f32 %v1307_v42, %v945_v34  ;;  %v1329_v48 = vadd.f32 %v1328_v47, %v1327_v45  ;;  %v1024_v49 = vadd.f32 %v1326_v44, %v983_v41 }
 0x121   : > { %v1027_v50 = vadd.f32 %v1329_v48, %v986_v46 }
 0x139   : > { %v1064_v51 = vpop.f32.mrb[8].mxu0 }
 0x13a   : > { %v1065_v53 = vadd.f32 %v1064_v51, %v1024_v49  ;;  %v1357_v54 = vpop.f32.mrb[9].mxu0 }
 0x13b   : > { %v1067_v55 = vpop.f32.mrb[10].mxu0 }
 0x13c   : > { %v1073_v57 = vadd.f32 %v1071_v52, %v1065_v53  ;;  %v1068_v58 = vadd.f32 %v1067_v55, %v1027_v50  ;;  %v1358_v59 = vpop.f32.mrb[11].mxu0 }
 0x13e   : > { %v1075_v60 = vmax.f32 %v1073_v57, 0.0  ;;  %v1074_v61 = vadd.f32 %v1072_v56, %v1068_v58 }
 0x140   : > { %1077 = vst [vmem:[%s224_s6] sm:$0xff] %v1075_v60  ;;  %v1076_v62 = vmax.f32 %v1074_v61, 0.0 }
 0x142   : > { %1078 = vst [vmem:[%s224_s6 + $0x8] sm:$0xff] %v1076_v62 }
 0x143 PF: > { %s14_s15 = sadd.s32 1, %s1461_s15  }
 0x144   : > { %p11_p4 = scmp.ge.s32.totalorder %s14_s15, 4  }
 0x146   :  { %13 = sbr.rel (!%p11_p4) target bundleno = 1 (0x1), region = 69 }

// kernel: _lambda_.19
= control target key start
LH: loop header
LB: loop body
LE: loop exit
PB: predicated region body
PF: predicated region fallthrough
CT: control target
= control target key end

     0   :  { %vm1124_vm0 = vmmov 0   ;;  %s1382_s1 = inlined_call_operand.vmem [shape: bf16[1152,128], index: 1, kind: input, shape index: {}]   ;;  %s1383_s0 = inlined_call_operand.vmem [shape: bf16[8,1152], index: 0, kind: input, shape index: {}]   ;;  %s1384_s2 = inlined_call_operand.vmem [shape: f32[1,128], index: 2, kind: input, shape index: {}]   ;;  %s1385_s3 = inlined_call_operand.vmem [shape: f32[8,128], index: 3, kind: output, shape index: {}]  }
   0x1   :  { %v1042_v0 = vld [vmem:[%s1382_s1 + $0x40] sm:$0xff]   ;;  %v1046_v4 = vld [vmem:[%s1382_s1 + $0x48] sm:$0xff]   ;;  %v1050_v8 = vld [vmem:[%s1382_s1 + $0x50] sm:$0xff]  }
   0x2   :  { %v1043_v1 = vld [vmem:[%s1382_s1] sm:$0xff]   ;;  %923 = vmatprep.subr.bf16.mxu0 %v1042_v0  ;;  %v1047_v5 = vld [vmem:[%s1382_s1 + $0x8] sm:$0xff]   ;;  %v1051_v9 = vld [vmem:[%s1382_s1 + $0x10] sm:$0xff]  }
   0x3   :  { %v1044_v2 = vld [vmem:[%s1382_s1 + $0xc0] sm:$0xff]   ;;  %924 = vmatpush3.bf16.msra.mxu0 %v1043_v1  ;;  %v1048_v6 = vld [vmem:[%s1382_s1 + $0xc8] sm:$0xff]   ;;  %v1052_v10 = vld [vmem:[%s1382_s1 + $0xd0] sm:$0xff]  }
   0x4   :  { %v1045_v3 = vld [vmem:[%s1382_s1 + $0x80] sm:$0xff]   ;;  %945 = vmatprep.subr.bf16.mxu1 %v1044_v2  ;;  %925 = vmatprep.subr.bf16.mxu0 %v1046_v4  ;;  %v1049_v7 = vld [vmem:[%s1382_s1 + $0x88] sm:$0xff]   ;;  %v1053_v11 = vld [vmem:[%s1382_s1 + $0x90] sm:$0xff]  }
   0x5   :  { %946 = vmatpush3.bf16.msra.mxu1 %v1045_v3  ;;  %v1054_v12 = vld [vmem:[%s1382_s1 + $0x58] sm:$0xff]   ;;  %v1058_v16 = vld [vmem:[%s1382_s1 + $0x60] sm:$0xff]   ;;  %v1062_v20 = vld [vmem:[%s1382_s1 + $0x68] sm:$0xff]  }
   0x6   :  { %947 = vmatprep.subr.bf16.mxu1 %v1048_v6  ;;  %v1055_v13 = vld [vmem:[%s1382_s1 + $0x18] sm:$0xff]   ;;  %v1059_v17 = vld [vmem:[%s1382_s1 + $0x20] sm:$0xff]   ;;  %v1063_v21 = vld [vmem:[%s1382_s1 + $0x28] sm:$0xff]  }
   0x7   :  { %926 = vmatpush3.bf16.msra.mxu0 %v1047_v5  ;;  %v1056_v14 = vld [vmem:[%s1382_s1 + $0xd8] sm:$0xff]   ;;  %v1060_v18 = vld [vmem:[%s1382_s1 + $0xe0] sm:$0xff]   ;;  %v1064_v22 = vld [vmem:[%s1382_s1 + $0xe8] sm:$0xff]  }
   0x8   :  { %927 = vmatprep.subr.bf16.mxu0 %v1050_v8  ;;  %v1057_v15 = vld [vmem:[%s1382_s1 + $0x98] sm:$0xff]   ;;  %v1061_v19 = vld [vmem:[%s1382_s1 + $0xa0] sm:$0xff]   ;;  %v1065_v23 = vld [vmem:[%s1382_s1 + $0xa8] sm:$0xff]  }
   0x9   :  { %948 = vmatpush3.bf16.msra.mxu1 %v1049_v7  ;;  %v1066_v24 = vld [vmem:[%s1382_s1 + $0x70] sm:$0xff]   ;;  %v1070_v28 = vld [vmem:[%s1382_s1 + $0x78] sm:$0xff]   ;;  %v15_v31 = vld [vmem:[%s1383_s0] sm:$0xff] }
   0xa   :  { %949 = vmatprep.subr.bf16.mxu1 %v1052_v10  ;;  %v1067_v25 = vld [vmem:[%s1382_s1 + $0x30] sm:$0xff]   ;;  %v1071_v29 = vld [vmem:[%s1382_s1 + $0x38] sm:$0xff]   ;;  %v842_v32 = vcombine.low %v15_v31, %v15_v31  ;;  %v843_v33 = vcombine.high %v15_v31, %v15_v31  ;;  %v1076_v35 = vld [vmem:[%s1382_s1 + $0x140] sm:$0xff]  }
   0xb   :  { %928 = vmatpush3.bf16.msra.mxu0 %v1051_v9  ;;  %v1068_v26 = vld [vmem:[%s1382_s1 + $0xf0] sm:$0xff]   ;;  %v1072_v30 = vld [vmem:[%s1382_s1 + $0xf8] sm:$0xff]   ;;  %v16_v36 = vld [vmem:[%s1383_s0 + $0x8] sm:$0xff]  ;;  %v1123_v9 = vmov 0.0  }
   0xc   :  { %929 = vmatprep.subr.bf16.mxu0 %v1054_v12  ;;  %v1069_v27 = vld [vmem:[%s1382_s1 + $0xb0] sm:$0xff]   ;;  %v1075_v34 = vld [vmem:[%s1382_s1 + $0xb8] sm:$0xff]   ;;  %667 = vmatprep.mubr.bf16.mxu0 %v843_v33  ;;  %v844_v37 = vcombine.low %v16_v36, %v16_v36  ;;  %v845_v38 = vcombine.high %v16_v36, %v16_v36  ;;  %v1079_v39 = vld [vmem:[%s1382_s1 + $0x100] sm:$0xff]  }
   0xd   :  { %950 = vmatpush3.bf16.msra.mxu1 %v1053_v11  ;;  %v1080_v40 = vld [vmem:[%s1382_s1 + $0x1c0] sm:$0xff]   ;;  %v1082_v42 = vld [vmem:[%s1382_s1 + $0x148] sm:$0xff]   ;;  %v1086_v46 = vld [vmem:[%s1382_s1 + $0x150] sm:$0xff]  }
   0xe   :  { %951 = vmatprep.subr.bf16.mxu1 %v1056_v14  ;;  %707 = vmatprep.mubr.bf16.mxu1 %v845_v38  ;;  %v1081_v41 = vld [vmem:[%s1382_s1 + $0x180] sm:$0xff]   ;;  %v1083_v43 = vld [vmem:[%s1382_s1 + $0x108] sm:$0xff]   ;;  %v1087_v47 = vld [vmem:[%s1382_s1 + $0x110] sm:$0xff]  }
   0xf   :  { %930 = vmatpush3.bf16.msra.mxu0 %v1055_v13  ;;  %v1084_v44 = vld [vmem:[%s1382_s1 + $0x1c8] sm:$0xff]   ;;  %v1088_v48 = vld [vmem:[%s1382_s1 + $0x1d0] sm:$0xff]   ;;  %v1090_v50 = vld [vmem:[%s1382_s1 + $0x158] sm:$0xff]  }
  0x10   :  { %931 = vmatprep.subr.bf16.mxu0 %v1058_v16  ;;  %v1085_v45 = vld [vmem:[%s1382_s1 + $0x188] sm:$0xff]   ;;  %v1089_v49 = vld [vmem:[%s1382_s1 + $0x190] sm:$0xff]   ;;  %v1091_v51 = vld [vmem:[%s1382_s1 + $0x118] sm:$0xff]  }
  0x11   :  { %952 = vmatpush3.bf16.msra.mxu1 %v1057_v15  ;;  %v1092_v52 = vld [vmem:[%s1382_s1 + $0x1d8] sm:$0xff]   ;;  %v1094_v54 = vld [vmem:[%s1382_s1 + $0x160] sm:$0xff]   ;;  %v1098_v58 = vld [vmem:[%s1382_s1 + $0x168] sm:$0xff]  }
  0x12   :  { %953 = vmatprep.subr.bf16.mxu1 %v1060_v18  ;;  %v1093_v53 = vld [vmem:[%s1382_s1 + $0x198] sm:$0xff]   ;;  %v1095_v55 = vld [vmem:[%s1382_s1 + $0x120] sm:$0xff]   ;;  %v1099_v59 = vld [vmem:[%s1382_s1 + $0x128] sm:$0xff]  }
  0x13   :  { %932 = vmatpush3.bf16.msra.mxu0 %v1059_v17  ;;  %v1096_v56 = vld [vmem:[%s1382_s1 + $0x1e0] sm:$0xff]   ;;  %v1100_v60 = vld [vmem:[%s1382_s1 + $0x1e8] sm:$0xff]   ;;  %v1102_v62 = vld [vmem:[%s1382_s1 + $0x170] sm:$0xff]  }
  0x14   :  { %933 = vmatprep.subr.bf16.mxu0 %v1062_v20  ;;  %v1097_v57 = vld [vmem:[%s1382_s1 + $0x1a0] sm:$0xff]   ;;  %v1101_v61 = vld [vmem:[%s1382_s1 + $0x1a8] sm:$0xff]   ;;  %v1103_v63 = vld [vmem:[%s1382_s1 + $0x130] sm:$0xff]  }
  0x15   :  { %954 = vmatpush3.bf16.msra.mxu1 %v1061_v19  ;;  %v1104_v0 = vld [vmem:[%s1382_s1 + $0x1f0] sm:$0xff]   ;;  %v1106_v2 = vld [vmem:[%s1382_s1 + $0x178] sm:$0xff]   ;;  %v1114_v13 = vld [vmem:[%s1382_s1 + $0x200] sm:$0xff]  }
  0x16   :  { %955 = vmatprep.subr.bf16.mxu1 %v1064_v22  ;;  %v1105_v1 = vld [vmem:[%s1382_s1 + $0x1b0] sm:$0xff]   ;;  %v1107_v3 = vld [vmem:[%s1382_s1 + $0x138] sm:$0xff]   ;;  %v1115_v14 = vld [vmem:[%s1382_s1 + $0x208] sm:$0xff]  }
  0x17   :  { %934 = vmatpush3.bf16.msra.mxu0 %v1063_v21  ;;  %v1108_v4 = vld [vmem:[%s1382_s1 + $0x1f8] sm:$0xff]   ;;  %v17_v5 = vld [vmem:[%s1383_s0 + $0x10] sm:$0xff]  ;;  %v1118_v17 = vld [vmem:[%s1382_s1 + $0x220] sm:$0xff]  }
  0x18   :  { %935 = vmatprep.subr.bf16.mxu0 %v1066_v24  ;;  %v846_v6 = vcombine.low %v17_v5, %v17_v5  ;;  %v847_v7 = vcombine.high %v17_v5, %v17_v5  ;;  %v1111_v8 = vld [vmem:[%s1382_s1 + $0x1b8] sm:$0xff]   ;;  %v1116_v15 = vld [vmem:[%s1382_s1 + $0x210] sm:$0xff]   ;;  %v1119_v18 = vld [vmem:[%s1382_s1 + $0x228] sm:$0xff]  }
  0x19   :  { %956 = vmatpush3.bf16.msra.mxu1 %v1065_v23  ;;  %v18_v10 = vld [vmem:[%s1383_s0 + $0x18] sm:$0xff]  ;;  %v1120_v19 = vld [vmem:[%s1382_s1 + $0x230] sm:$0xff]   ;;  %v1122_v21 = vld [vmem:[%s1383_s0 + $0x20] ss:$0 sps:$4 sm:$0xff]  }
  0x1a   :  { %957 = vmatprep.subr.bf16.mxu1 %v1068_v26  ;;  %v848_v11 = vcombine.low %v18_v10, %v18_v10  ;;  %v849_v12 = vcombine.high %v18_v10, %v18_v10  ;;  %v1117_v16 = vld [vmem:[%s1382_s1 + $0x218] sm:$0xff]   ;;  %v841_v23 = vld [vmem:[%s1384_s2] ss:$0 sm:$0xff] }
  0x1b   :  { %936 = vmatpush3.bf16.msra.mxu0 %v1067_v25  ;;  %v1121_v20 = vld [vmem:[%s1382_s1 + $0x238] sm:$0xff]  }
  0x1c   :  { %937 = vmatprep.subr.bf16.mxu0 %v1070_v28 }
  0x1d   :  { %958 = vmatpush3.bf16.msra.mxu1 %v1069_v27 }
  0x1e   :  { %959 = vmatprep.subr.bf16.mxu1 %v1072_v30 }
  0x1f   :  { %938 = vmatpush3.bf16.msra.mxu0 %v1071_v29 }
  0x20   :  { %967 = vmatprep.subr.bf16.mxu0 %v1076_v35 }
  0x21   :  { %960 = vmatpush3.bf16.msra.mxu1 %v1075_v34 }
  0x22   :  { %668 = vmatmul.mubr.bf16.vlgmr.msra.gmra.mrb[0].mxu0 %v842_v32  ;;  %989 = vmatprep.subr.bf16.mxu1 %v1080_v40 }
  0x23   :  { %968 = vmatpush3.bf16.msra.mxu0 %v1079_v39  ;;  %747 = vmatprep.mubr.bf16.mxu0 %v847_v7 }
  0x24   :  { %708 = vmatmul.mubr.bf16.vlgmr.msra.gmra.mrb[0].mxu1 %v844_v37  ;;  %969 = vmatprep.subr.bf16.mxu0 %v1082_v42 }
  0x25   :  { %990 = vmatpush3.bf16.msra.mxu1 %v1081_v41  ;;  %787 = vmatprep.mubr.bf16.mxu1 %v849_v12 }
  0x26   :  { %991 = vmatprep.subr.bf16.mxu1 %v1084_v44 }
  0x27   :  { %970 = vmatpush3.bf16.msra.mxu0 %v1083_v43 }
  0x28   :  { %971 = vmatprep.subr.bf16.mxu0 %v1086_v46 }
  0x29   :  { %992 = vmatpush3.bf16.msra.mxu1 %v1085_v45 }
  0x2a   :  { %993 = vmatprep.subr.bf16.mxu1 %v1088_v48 }
  0x2b   :  { %972 = vmatpush3.bf16.msra.mxu0 %v1087_v47 }
  0x2c   :  { %973 = vmatprep.subr.bf16.mxu0 %v1090_v50 }
  0x2d   :  { %994 = vmatpush3.bf16.msra.mxu1 %v1089_v49 }
  0x2e   :  { %995 = vmatprep.subr.bf16.mxu1 %v1092_v52 }
  0x2f   :  { %974 = vmatpush3.bf16.msra.mxu0 %v1091_v51 }
  0x30   :  { %975 = vmatprep.subr.bf16.mxu0 %v1094_v54 }
  0x31   :  { %996 = vmatpush3.bf16.msra.mxu1 %v1093_v53 }
  0x32   :  { %997 = vmatprep.subr.bf16.mxu1 %v1096_v56 }
  0x33   :  { %976 = vmatpush3.bf16.msra.mxu0 %v1095_v55 }
  0x34   :  { %977 = vmatprep.subr.bf16.mxu0 %v1098_v58 }
  0x35   :  { %998 = vmatpush3.bf16.msra.mxu1 %v1097_v57 }
  0x36   :  { %999 = vmatprep.subr.bf16.mxu1 %v1100_v60 }
  0x37   :  { %978 = vmatpush3.bf16.msra.mxu0 %v1099_v59 }
  0x38   :  { %979 = vmatprep.subr.bf16.mxu0 %v1102_v62 }
  0x39   :  { %1000 = vmatpush3.bf16.msra.mxu1 %v1101_v61 }
  0x3a   :  { %1001 = vmatprep.subr.bf16.mxu1 %v1104_v0 }
  0x3b   :  { %980 = vmatpush3.bf16.msra.mxu0 %v1103_v63 }
  0x3c   :  { %981 = vmatprep.subr.bf16.mxu0 %v1106_v2 }
  0x3d   :  { %1002 = vmatpush3.bf16.msra.mxu1 %v1105_v1 }
  0x3e   :  { %1003 = vmatprep.subr.bf16.mxu1 %v1108_v4 }
  0x3f   :  { %982 = vmatpush3.bf16.msra.mxu0 %v1107_v3 }
  0x40   :  { %1020 = vmatprep.subr.bf16.mxu0 %v1123_v9 }
  0x41   :  { %1004 = vmatpush3.bf16.msra.mxu1 %v1111_v8 }
  0x42   :  { %748 = vmatmul.mubr.bf16.vlgmr.msra.gmra.mrb[4].mxu0 %v846_v6 }
  0x43   :  { %1021 = vmatpush3.bf16.msra.mxu0 %v1114_v13  ;;  %1036 = vmatprep.mubr.msk.bf16.mxu0 %vm1124_vm0, %v1123_v9 }
  0x44   :  { %788 = vmatmul.mubr.bf16.vlgmr.msra.gmra.mrb[4].mxu1 %v848_v11  ;;  %1022 = vmatprep.subr.bf16.mxu0 %v1123_v9 }
  0x47   :  { %1023 = vmatpush3.bf16.msra.mxu0 %v1115_v14 }
  0x48   :  { %1024 = vmatprep.subr.bf16.mxu0 %v1123_v9 }
  0x4b   :  { %1025 = vmatpush3.bf16.msra.mxu0 %v1116_v15 }
  0x4c   :  { %1026 = vmatprep.subr.bf16.mxu0 %v1123_v9 }
  0x4f   :  { %1027 = vmatpush3.bf16.msra.mxu0 %v1117_v16 }
  0x50   :  { %1028 = vmatprep.subr.bf16.mxu0 %v1123_v9 }
  0x53   :  { %1029 = vmatpush3.bf16.msra.mxu0 %v1118_v17 }
  0x54   :  { %1030 = vmatprep.subr.bf16.mxu0 %v1123_v9 }
  0x57   :  { %1031 = vmatpush3.bf16.msra.mxu0 %v1119_v18 }
  0x58   :  { %1032 = vmatprep.subr.bf16.mxu0 %v1123_v9 }
  0x5b   :  { %1033 = vmatpush3.bf16.msra.mxu0 %v1120_v19 }
  0x5c   :  { %1034 = vmatprep.subr.bf16.mxu0 %v1123_v9 }
  0x5f   :  { %1035 = vmatpush3.bf16.msra.mxu0 %v1121_v20 }
  0x62   :  { %1037 = vmatmul.mubr.bf16.vlgmr.msra.gmra.mrb[8].mxu0 %v1122_v21 }
  0xf5   :  { %v939_v22 = vpop.f32.mrb[0].mxu0 }
  0xf6   :  { %v940_v24 = vpop.f32.mrb[1].mxu0 }
  0xf7   :  { %v941_v25 = vadd.f32 %v940_v24, %v939_v22  ;;  %v942_v26 = vpop.f32.mrb[2].mxu0  ;;  %v961_v27 = vpop.f32.mrb[0].mxu1 }
  0xf8   :  { %v943_v28 = vpop.f32.mrb[3].mxu0  ;;  %v962_v29 = vpop.f32.mrb[1].mxu1 }
  0xf9   :  { %v670_v30 = vadd.f32 %v941_v25, %v841_v23  ;;  %v963_v31 = vadd.f32 %v962_v29, %v961_v27  ;;  %v964_v32 = vpop.f32.mrb[2].mxu1 }
  0xfa   :  { %v965_v33 = vpop.f32.mrb[3].mxu1 }
  0xfb   :  { %v710_v34 = vadd.f32 %v963_v31, %v670_v30 }
 0x115   :  { %v983_v35 = vpop.f32.mrb[4].mxu0 }
 0x116   :  { %v984_v36 = vpop.f32.mrb[5].mxu0 }
 0x117   :  { %v985_v37 = vadd.f32 %v984_v36, %v983_v35  ;;  %v986_v38 = vpop.f32.mrb[6].mxu0  ;;  %v1005_v39 = vpop.f32.mrb[4].mxu1 }
 0x118   :  { %v987_v40 = vpop.f32.mrb[7].mxu0  ;;  %v1006_v41 = vpop.f32.mrb[5].mxu1 }
 0x119   :  { %v750_v42 = vadd.f32 %v985_v37, %v710_v34  ;;  %v1007_v43 = vadd.f32 %v1006_v41, %v1005_v39  ;;  %v1008_v44 = vpop.f32.mrb[6].mxu1 }
 0x11a   :  { %v1009_v45 = vpop.f32.mrb[7].mxu1 }
 0x11b   :  { %v790_v46 = vadd.f32 %v1007_v43, %v750_v42 }
 0x135   :  { %v829_v47 = vpop.f32.mrb[8].mxu0 }
 0x136   :  { %v830_v48 = vadd.f32 %v829_v47, %v790_v46  ;;  %v1038_v49 = vpop.f32.mrb[9].mxu0 }
 0x137   :  { %v832_v50 = vpop.f32.mrb[10].mxu0 }
 0x138   :  { %v835_v51 = vmax.f32 %v830_v48, 0.0  ;;  %v1039_v52 = vpop.f32.mrb[11].mxu0 }
 0x13a   :  { %836 = vst [vmem:[%s1385_s3] sm:$0xff] %v835_v51 }

// kernel: _lambda_.20
= control target key start
LH: loop header
LB: loop body
LE: loop exit
PB: predicated region body
PF: predicated region fallthrough
CT: control target
= control target key end

     0   :  { %v180_v0 = vmov 0.0   ;;  %vm181_vm0 = vmmov 0   ;;  %s235_s1 = inlined_call_operand.vmem [shape: bf16[128,128], index: 1, kind: input, shape index: {}]   ;;  %s236_s0 = inlined_call_operand.vmem [shape: bf16[8,128], index: 0, kind: input, shape index: {}]   ;;  %s237_s2 = inlined_call_operand.vmem [shape: f32[1,128], index: 2, kind: input, shape index: {}]   ;;  %s238_s3 = inlined_call_operand.vmem [shape: f32[8,128], index: 3, kind: output, shape index: {}]  }
   0x1   :  { %150 = vmatprep.subr.bf16.mxu0 %v180_v0  ;;  %v172_v1 = vld [vmem:[%s235_s1] sm:$0xff]   ;;  %166 = vmatprep.mubr.msk.bf16.mxu0 %vm181_vm0, %v180_v0  ;;  %v173_v2 = vld [vmem:[%s235_s1 + $0x8] sm:$0xff]   ;;  %v174_v3 = vld [vmem:[%s235_s1 + $0x10] sm:$0xff]  }
   0x2   :  { %151 = vmatpush3.bf16.msra.mxu0 %v172_v1  ;;  %v175_v4 = vld [vmem:[%s235_s1 + $0x18] sm:$0xff]   ;;  %v176_v5 = vld [vmem:[%s235_s1 + $0x20] sm:$0xff]   ;;  %v177_v6 = vld [vmem:[%s235_s1 + $0x28] sm:$0xff]  }
   0x3   :  { %152 = vmatprep.subr.bf16.mxu0 %v180_v0  ;;  %v178_v7 = vld [vmem:[%s235_s1 + $0x30] sm:$0xff]   ;;  %v179_v8 = vld [vmem:[%s235_s1 + $0x38] sm:$0xff]   ;;  %v15_v9 = vld [vmem:[%s236_s0] sm:$0xf] }
   0x4   :  { %v132_v10 = vld [vmem:[%s237_s2] ss:$0 sm:$0xff] }
   0x6   :  { %153 = vmatpush3.bf16.msra.mxu0 %v173_v2 }
   0x7   :  { %154 = vmatprep.subr.bf16.mxu0 %v180_v0 }
   0xa   :  { %155 = vmatpush3.bf16.msra.mxu0 %v174_v3 }
   0xb   :  { %156 = vmatprep.subr.bf16.mxu0 %v180_v0 }
   0xe   :  { %157 = vmatpush3.bf16.msra.mxu0 %v175_v4 }
   0xf   :  { %158 = vmatprep.subr.bf16.mxu0 %v180_v0 }
  0x12   :  { %159 = vmatpush3.bf16.msra.mxu0 %v176_v5 }
  0x13   :  { %160 = vmatprep.subr.bf16.mxu0 %v180_v0 }
  0x16   :  { %161 = vmatpush3.bf16.msra.mxu0 %v177_v6 }
  0x17   :  { %162 = vmatprep.subr.bf16.mxu0 %v180_v0 }
  0x1a   :  { %163 = vmatpush3.bf16.msra.mxu0 %v178_v7 }
  0x1b   :  { %164 = vmatprep.subr.bf16.mxu0 %v180_v0 }
  0x1e   :  { %165 = vmatpush3.bf16.msra.mxu0 %v179_v8 }
  0x21   :  { %167 = vmatmul.mubr.bf16.vlgmr.msra.gmra.mrb[0].mxu0 %v15_v9 }
  0xf4   :  { %v121_v11 = vpop.f32.mrb[0].mxu0 }
  0xf5   :  { %v122_v12 = vadd.f32 %v132_v10, %v121_v11  ;;  %v168_v13 = vpop.f32.mrb[1].mxu0 }
  0xf6   :  { %v124_v14 = vpop.f32.mrb[2].mxu0 }
  0xf7   :  { %127 = vst [vmem:[%s238_s3] sm:$0xff] %v122_v12  ;;  %v169_v15 = vpop.f32.mrb[3].mxu0 }

// kernel: _lambda_.21
= control target key start
LH: loop header
LB: loop body
LE: loop exit
PB: predicated region body
PF: predicated region fallthrough
CT: control target
= control target key end

     0   :  { %vm1129_vm0 = vmmov 0   ;;  %s1395_s1 = inlined_call_operand.vmem [shape: bf16[1152,128], index: 1, kind: input, shape index: {}]   ;;  %s1396_s0 = inlined_call_operand.vmem [shape: bf16[8,1152], index: 0, kind: input, shape index: {}]   ;;  %s1397_s2 = inlined_call_operand.vmem [shape: f32[1,128], index: 2, kind: input, shape index: {}]   ;;  %s1398_s3 = inlined_call_operand.vmem [shape: f32[8,128], index: 3, kind: input, shape index: {}]   ;;  %s1399_s4 = inlined_call_operand.vmem [shape: f32[8,128], index: 4, kind: output, shape index: {}]  }
   0x1   :  { %v1047_v0 = vld [vmem:[%s1395_s1 + $0x40] sm:$0xff]   ;;  %v1051_v4 = vld [vmem:[%s1395_s1 + $0x48] sm:$0xff]   ;;  %v1055_v8 = vld [vmem:[%s1395_s1 + $0x50] sm:$0xff]  }
   0x2   :  { %v1048_v1 = vld [vmem:[%s1395_s1] sm:$0xff]   ;;  %928 = vmatprep.subr.bf16.mxu0 %v1047_v0  ;;  %v1052_v5 = vld [vmem:[%s1395_s1 + $0x8] sm:$0xff]   ;;  %v1056_v9 = vld [vmem:[%s1395_s1 + $0x10] sm:$0xff]  }
   0x3   :  { %v1049_v2 = vld [vmem:[%s1395_s1 + $0xc0] sm:$0xff]   ;;  %929 = vmatpush3.bf16.msra.mxu0 %v1048_v1  ;;  %v1053_v6 = vld [vmem:[%s1395_s1 + $0xc8] sm:$0xff]   ;;  %v1057_v10 = vld [vmem:[%s1395_s1 + $0xd0] sm:$0xff]  }
   0x4   :  { %v1050_v3 = vld [vmem:[%s1395_s1 + $0x80] sm:$0xff]   ;;  %950 = vmatprep.subr.bf16.mxu1 %v1049_v2  ;;  %930 = vmatprep.subr.bf16.mxu0 %v1051_v4  ;;  %v1054_v7 = vld [vmem:[%s1395_s1 + $0x88] sm:$0xff]   ;;  %v1058_v11 = vld [vmem:[%s1395_s1 + $0x90] sm:$0xff]  }
   0x5   :  { %951 = vmatpush3.bf16.msra.mxu1 %v1050_v3  ;;  %v1059_v12 = vld [vmem:[%s1395_s1 + $0x58] sm:$0xff]   ;;  %v1063_v16 = vld [vmem:[%s1395_s1 + $0x60] sm:$0xff]   ;;  %v1067_v20 = vld [vmem:[%s1395_s1 + $0x68] sm:$0xff]  }
   0x6   :  { %952 = vmatprep.subr.bf16.mxu1 %v1053_v6  ;;  %v1060_v13 = vld [vmem:[%s1395_s1 + $0x18] sm:$0xff]   ;;  %v1064_v17 = vld [vmem:[%s1395_s1 + $0x20] sm:$0xff]   ;;  %v1068_v21 = vld [vmem:[%s1395_s1 + $0x28] sm:$0xff]  }
   0x7   :  { %931 = vmatpush3.bf16.msra.mxu0 %v1052_v5  ;;  %v1061_v14 = vld [vmem:[%s1395_s1 + $0xd8] sm:$0xff]   ;;  %v1065_v18 = vld [vmem:[%s1395_s1 + $0xe0] sm:$0xff]   ;;  %v1069_v22 = vld [vmem:[%s1395_s1 + $0xe8] sm:$0xff]  }
   0x8   :  { %932 = vmatprep.subr.bf16.mxu0 %v1055_v8  ;;  %v1062_v15 = vld [vmem:[%s1395_s1 + $0x98] sm:$0xff]   ;;  %v1066_v19 = vld [vmem:[%s1395_s1 + $0xa0] sm:$0xff]   ;;  %v1070_v23 = vld [vmem:[%s1395_s1 + $0xa8] sm:$0xff]  }
   0x9   :  { %953 = vmatpush3.bf16.msra.mxu1 %v1054_v7  ;;  %v1071_v24 = vld [vmem:[%s1395_s1 + $0x70] sm:$0xff]   ;;  %v1075_v28 = vld [vmem:[%s1395_s1 + $0x78] sm:$0xff]   ;;  %v18_v31 = vld [vmem:[%s1396_s0] sm:$0xff] }
   0xa   :  { %954 = vmatprep.subr.bf16.mxu1 %v1057_v10  ;;  %v1072_v25 = vld [vmem:[%s1395_s1 + $0x30] sm:$0xff]   ;;  %v1076_v29 = vld [vmem:[%s1395_s1 + $0x38] sm:$0xff]   ;;  %v847_v32 = vcombine.low %v18_v31, %v18_v31  ;;  %v848_v33 = vcombine.high %v18_v31, %v18_v31  ;;  %v1081_v35 = vld [vmem:[%s1395_s1 + $0x140] sm:$0xff]  }
   0xb   :  { %933 = vmatpush3.bf16.msra.mxu0 %v1056_v9  ;;  %v1073_v26 = vld [vmem:[%s1395_s1 + $0xf0] sm:$0xff]   ;;  %v1077_v30 = vld [vmem:[%s1395_s1 + $0xf8] sm:$0xff]   ;;  %v19_v36 = vld [vmem:[%s1396_s0 + $0x8] sm:$0xff]  ;;  %v1128_v9 = vmov 0.0  }
   0xc   :  { %934 = vmatprep.subr.bf16.mxu0 %v1059_v12  ;;  %v1074_v27 = vld [vmem:[%s1395_s1 + $0xb0] sm:$0xff]   ;;  %v1080_v34 = vld [vmem:[%s1395_s1 + $0xb8] sm:$0xff]   ;;  %670 = vmatprep.mubr.bf16.mxu0 %v848_v33  ;;  %v849_v37 = vcombine.low %v19_v36, %v19_v36  ;;  %v850_v38 = vcombine.high %v19_v36, %v19_v36  ;;  %v1084_v39 = vld [vmem:[%s1395_s1 + $0x100] sm:$0xff]  }
   0xd   :  { %955 = vmatpush3.bf16.msra.mxu1 %v1058_v11  ;;  %v1085_v40 = vld [vmem:[%s1395_s1 + $0x1c0] sm:$0xff]   ;;  %v1087_v42 = vld [vmem:[%s1395_s1 + $0x148] sm:$0xff]   ;;  %v1091_v46 = vld [vmem:[%s1395_s1 + $0x150] sm:$0xff]  }
   0xe   :  { %956 = vmatprep.subr.bf16.mxu1 %v1061_v14  ;;  %710 = vmatprep.mubr.bf16.mxu1 %v850_v38  ;;  %v1086_v41 = vld [vmem:[%s1395_s1 + $0x180] sm:$0xff]   ;;  %v1088_v43 = vld [vmem:[%s1395_s1 + $0x108] sm:$0xff]   ;;  %v1092_v47 = vld [vmem:[%s1395_s1 + $0x110] sm:$0xff]  }
   0xf   :  { %935 = vmatpush3.bf16.msra.mxu0 %v1060_v13  ;;  %v1089_v44 = vld [vmem:[%s1395_s1 + $0x1c8] sm:$0xff]   ;;  %v1093_v48 = vld [vmem:[%s1395_s1 + $0x1d0] sm:$0xff]   ;;  %v1095_v50 = vld [vmem:[%s1395_s1 + $0x158] sm:$0xff]  }
  0x10   :  { %936 = vmatprep.subr.bf16.mxu0 %v1063_v16  ;;  %v1090_v45 = vld [vmem:[%s1395_s1 + $0x188] sm:$0xff]   ;;  %v1094_v49 = vld [vmem:[%s1395_s1 + $0x190] sm:$0xff]   ;;  %v1096_v51 = vld [vmem:[%s1395_s1 + $0x118] sm:$0xff]  }
  0x11   :  { %957 = vmatpush3.bf16.msra.mxu1 %v1062_v15  ;;  %v1097_v52 = vld [vmem:[%s1395_s1 + $0x1d8] sm:$0xff]   ;;  %v1099_v54 = vld [vmem:[%s1395_s1 + $0x160] sm:$0xff]   ;;  %v1103_v58 = vld [vmem:[%s1395_s1 + $0x168] sm:$0xff]  }
  0x12   :  { %958 = vmatprep.subr.bf16.mxu1 %v1065_v18  ;;  %v1098_v53 = vld [vmem:[%s1395_s1 + $0x198] sm:$0xff]   ;;  %v1100_v55 = vld [vmem:[%s1395_s1 + $0x120] sm:$0xff]   ;;  %v1104_v59 = vld [vmem:[%s1395_s1 + $0x128] sm:$0xff]  }
  0x13   :  { %937 = vmatpush3.bf16.msra.mxu0 %v1064_v17  ;;  %v1101_v56 = vld [vmem:[%s1395_s1 + $0x1e0] sm:$0xff]   ;;  %v1105_v60 = vld [vmem:[%s1395_s1 + $0x1e8] sm:$0xff]   ;;  %v1107_v62 = vld [vmem:[%s1395_s1 + $0x170] sm:$0xff]  }
  0x14   :  { %938 = vmatprep.subr.bf16.mxu0 %v1067_v20  ;;  %v1102_v57 = vld [vmem:[%s1395_s1 + $0x1a0] sm:$0xff]   ;;  %v1106_v61 = vld [vmem:[%s1395_s1 + $0x1a8] sm:$0xff]   ;;  %v1108_v63 = vld [vmem:[%s1395_s1 + $0x130] sm:$0xff]  }
  0x15   :  { %959 = vmatpush3.bf16.msra.mxu1 %v1066_v19  ;;  %v1109_v0 = vld [vmem:[%s1395_s1 + $0x1f0] sm:$0xff]   ;;  %v1111_v2 = vld [vmem:[%s1395_s1 + $0x178] sm:$0xff]   ;;  %v1119_v13 = vld [vmem:[%s1395_s1 + $0x200] sm:$0xff]  }
  0x16   :  { %960 = vmatprep.subr.bf16.mxu1 %v1069_v22  ;;  %v1110_v1 = vld [vmem:[%s1395_s1 + $0x1b0] sm:$0xff]   ;;  %v1112_v3 = vld [vmem:[%s1395_s1 + $0x138] sm:$0xff]   ;;  %v1120_v14 = vld [vmem:[%s1395_s1 + $0x208] sm:$0xff]  }
  0x17   :  { %939 = vmatpush3.bf16.msra.mxu0 %v1068_v21  ;;  %v1113_v4 = vld [vmem:[%s1395_s1 + $0x1f8] sm:$0xff]   ;;  %v20_v5 = vld [vmem:[%s1396_s0 + $0x10] sm:$0xff]  ;;  %v1123_v17 = vld [vmem:[%s1395_s1 + $0x220] sm:$0xff]  }
  0x18   :  { %940 = vmatprep.subr.bf16.mxu0 %v1071_v24  ;;  %v851_v6 = vcombine.low %v20_v5, %v20_v5  ;;  %v852_v7 = vcombine.high %v20_v5, %v20_v5  ;;  %v1116_v8 = vld [vmem:[%s1395_s1 + $0x1b8] sm:$0xff]   ;;  %v1121_v15 = vld [vmem:[%s1395_s1 + $0x210] sm:$0xff]   ;;  %v1124_v18 = vld [vmem:[%s1395_s1 + $0x228] sm:$0xff]  }
  0x19   :  { %961 = vmatpush3.bf16.msra.mxu1 %v1070_v23  ;;  %v21_v10 = vld [vmem:[%s1396_s0 + $0x18] sm:$0xff]  ;;  %v1125_v19 = vld [vmem:[%s1395_s1 + $0x230] sm:$0xff]   ;;  %v1127_v21 = vld [vmem:[%s1396_s0 + $0x20] ss:$0 sps:$4 sm:$0xff]  }
  0x1a   :  { %962 = vmatprep.subr.bf16.mxu1 %v1073_v26  ;;  %v853_v11 = vcombine.low %v21_v10, %v21_v10  ;;  %v854_v12 = vcombine.high %v21_v10, %v21_v10  ;;  %v1122_v16 = vld [vmem:[%s1395_s1 + $0x218] sm:$0xff]   ;;  %v846_v23 = vld [vmem:[%s1397_s2] ss:$0 sm:$0xff] }
  0x1b   :  { %941 = vmatpush3.bf16.msra.mxu0 %v1072_v25  ;;  %v1126_v20 = vld [vmem:[%s1395_s1 + $0x238] sm:$0xff]  }
  0x1c   :  { %942 = vmatprep.subr.bf16.mxu0 %v1075_v28 }
  0x1d   :  { %963 = vmatpush3.bf16.msra.mxu1 %v1074_v27 }
  0x1e   :  { %964 = vmatprep.subr.bf16.mxu1 %v1077_v30 }
  0x1f   :  { %943 = vmatpush3.bf16.msra.mxu0 %v1076_v29 }
  0x20   :  { %972 = vmatprep.subr.bf16.mxu0 %v1081_v35 }
  0x21   :  { %965 = vmatpush3.bf16.msra.mxu1 %v1080_v34 }
  0x22   :  { %671 = vmatmul.mubr.bf16.vlgmr.msra.gmra.mrb[0].mxu0 %v847_v32  ;;  %994 = vmatprep.subr.bf16.mxu1 %v1085_v40 }
  0x23   :  { %973 = vmatpush3.bf16.msra.mxu0 %v1084_v39  ;;  %750 = vmatprep.mubr.bf16.mxu0 %v852_v7 }
  0x24   :  { %711 = vmatmul.mubr.bf16.vlgmr.msra.gmra.mrb[0].mxu1 %v849_v37  ;;  %974 = vmatprep.subr.bf16.mxu0 %v1087_v42 }
  0x25   :  { %995 = vmatpush3.bf16.msra.mxu1 %v1086_v41  ;;  %790 = vmatprep.mubr.bf16.mxu1 %v854_v12 }
  0x26   :  { %996 = vmatprep.subr.bf16.mxu1 %v1089_v44 }
  0x27   :  { %975 = vmatpush3.bf16.msra.mxu0 %v1088_v43 }
  0x28   :  { %976 = vmatprep.subr.bf16.mxu0 %v1091_v46 }
  0x29   :  { %997 = vmatpush3.bf16.msra.mxu1 %v1090_v45 }
  0x2a   :  { %998 = vmatprep.subr.bf16.mxu1 %v1093_v48  ;;  %v838_v48 = vld [vmem:[%s1398_s3] sm:$0xff] }
  0x2b   :  { %977 = vmatpush3.bf16.msra.mxu0 %v1092_v47 }
  0x2c   :  { %978 = vmatprep.subr.bf16.mxu0 %v1095_v50 }
  0x2d   :  { %999 = vmatpush3.bf16.msra.mxu1 %v1094_v49 }
  0x2e   :  { %1000 = vmatprep.subr.bf16.mxu1 %v1097_v52 }
  0x2f   :  { %979 = vmatpush3.bf16.msra.mxu0 %v1096_v51 }
  0x30   :  { %980 = vmatprep.subr.bf16.mxu0 %v1099_v54 }
  0x31   :  { %1001 = vmatpush3.bf16.msra.mxu1 %v1098_v53 }
  0x32   :  { %1002 = vmatprep.subr.bf16.mxu1 %v1101_v56 }
  0x33   :  { %981 = vmatpush3.bf16.msra.mxu0 %v1100_v55 }
  0x34   :  { %982 = vmatprep.subr.bf16.mxu0 %v1103_v58 }
  0x35   :  { %1003 = vmatpush3.bf16.msra.mxu1 %v1102_v57 }
  0x36   :  { %1004 = vmatprep.subr.bf16.mxu1 %v1105_v60 }
  0x37   :  { %983 = vmatpush3.bf16.msra.mxu0 %v1104_v59 }
  0x38   :  { %984 = vmatprep.subr.bf16.mxu0 %v1107_v62 }
  0x39   :  { %1005 = vmatpush3.bf16.msra.mxu1 %v1106_v61 }
  0x3a   :  { %1006 = vmatprep.subr.bf16.mxu1 %v1109_v0 }
  0x3b   :  { %985 = vmatpush3.bf16.msra.mxu0 %v1108_v63 }
  0x3c   :  { %986 = vmatprep.subr.bf16.mxu0 %v1111_v2 }
  0x3d   :  { %1007 = vmatpush3.bf16.msra.mxu1 %v1110_v1 }
  0x3e   :  { %1008 = vmatprep.subr.bf16.mxu1 %v1113_v4 }
  0x3f   :  { %987 = vmatpush3.bf16.msra.mxu0 %v1112_v3 }
  0x40   :  { %1025 = vmatprep.subr.bf16.mxu0 %v1128_v9 }
  0x41   :  { %1009 = vmatpush3.bf16.msra.mxu1 %v1116_v8 }
  0x42   :  { %751 = vmatmul.mubr.bf16.vlgmr.msra.gmra.mrb[4].mxu0 %v851_v6 }
  0x43   :  { %1026 = vmatpush3.bf16.msra.mxu0 %v1119_v13  ;;  %1041 = vmatprep.mubr.msk.bf16.mxu0 %vm1129_vm0, %v1128_v9 }
  0x44   :  { %791 = vmatmul.mubr.bf16.vlgmr.msra.gmra.mrb[4].mxu1 %v853_v11  ;;  %1027 = vmatprep.subr.bf16.mxu0 %v1128_v9 }
  0x47   :  { %1028 = vmatpush3.bf16.msra.mxu0 %v1120_v14 }
  0x48   :  { %1029 = vmatprep.subr.bf16.mxu0 %v1128_v9 }
  0x4b   :  { %1030 = vmatpush3.bf16.msra.mxu0 %v1121_v15 }
  0x4c   :  { %1031 = vmatprep.subr.bf16.mxu0 %v1128_v9 }
  0x4f   :  { %1032 = vmatpush3.bf16.msra.mxu0 %v1122_v16 }
  0x50   :  { %1033 = vmatprep.subr.bf16.mxu0 %v1128_v9 }
  0x53   :  { %1034 = vmatpush3.bf16.msra.mxu0 %v1123_v17 }
  0x54   :  { %1035 = vmatprep.subr.bf16.mxu0 %v1128_v9 }
  0x57   :  { %1036 = vmatpush3.bf16.msra.mxu0 %v1124_v18 }
  0x58   :  { %1037 = vmatprep.subr.bf16.mxu0 %v1128_v9 }
  0x5b   :  { %1038 = vmatpush3.bf16.msra.mxu0 %v1125_v19 }
  0x5c   :  { %1039 = vmatprep.subr.bf16.mxu0 %v1128_v9 }
  0x5f   :  { %1040 = vmatpush3.bf16.msra.mxu0 %v1126_v20 }
  0x62   :  { %1042 = vmatmul.mubr.bf16.vlgmr.msra.gmra.mrb[8].mxu0 %v1127_v21 }
  0xf5   :  { %v944_v22 = vpop.f32.mrb[0].mxu0 }
  0xf6   :  { %v945_v24 = vpop.f32.mrb[1].mxu0 }
  0xf7   :  { %v946_v25 = vadd.f32 %v945_v24, %v944_v22  ;;  %v947_v26 = vpop.f32.mrb[2].mxu0  ;;  %v966_v27 = vpop.f32.mrb[0].mxu1 }
  0xf8   :  { %v948_v28 = vpop.f32.mrb[3].mxu0  ;;  %v967_v29 = vpop.f32.mrb[1].mxu1 }
  0xf9   :  { %v673_v30 = vadd.f32 %v946_v25, %v846_v23  ;;  %v968_v31 = vadd.f32 %v967_v29, %v966_v27  ;;  %v969_v32 = vpop.f32.mrb[2].mxu1 }
  0xfa   :  { %v970_v33 = vpop.f32.mrb[3].mxu1 }
  0xfb   :  { %v713_v34 = vadd.f32 %v968_v31, %v673_v30 }
 0x115   :  { %v988_v35 = vpop.f32.mrb[4].mxu0 }
 0x116   :  { %v989_v36 = vpop.f32.mrb[5].mxu0 }
 0x117   :  { %v990_v37 = vadd.f32 %v989_v36, %v988_v35  ;;  %v991_v38 = vpop.f32.mrb[6].mxu0  ;;  %v1010_v39 = vpop.f32.mrb[4].mxu1 }
 0x118   :  { %v992_v40 = vpop.f32.mrb[7].mxu0  ;;  %v1011_v41 = vpop.f32.mrb[5].mxu1 }
 0x119   :  { %v753_v42 = vadd.f32 %v990_v37, %v713_v34  ;;  %v1012_v43 = vadd.f32 %v1011_v41, %v1010_v39  ;;  %v1013_v44 = vpop.f32.mrb[6].mxu1 }
 0x11a   :  { %v1014_v45 = vpop.f32.mrb[7].mxu1 }
 0x11b   :  { %v793_v46 = vadd.f32 %v1012_v43, %v753_v42 }
 0x135   :  { %v832_v47 = vpop.f32.mrb[8].mxu0 }
 0x136   :  { %v833_v49 = vadd.f32 %v832_v47, %v793_v46  ;;  %v1043_v50 = vpop.f32.mrb[9].mxu0 }
 0x137   :  { %v835_v51 = vpop.f32.mrb[10].mxu0 }
 0x138   :  { %v839_v52 = vadd.f32 %v838_v48, %v833_v49  ;;  %v1044_v53 = vpop.f32.mrb[11].mxu0 }
 0x13a   :  { %v840_v54 = vmax.f32 %v839_v52, 0.0 }
 0x13c   :  { %841 = vst [vmem:[%s1399_s4] sm:$0xff] %v840_v54 }

</bundles_post_ra>
